<compile_context>
chip_gen: v6e
topology: v6e:2x2x1
jax: 0.10.0
libtpu: 0.0.40
codegen_flags: <defaults>
</compile_context>

<pallas_src>
import numpy as np
import jax
import jax.numpy as jnp
from jax import lax
from jax.experimental import pallas as pl
from jax.experimental.pallas import tpu as pltpu


def _erf_f32(z):
    """Abramowitz & Stegun 7.1.26 erf approximation, max abs error ~1.5e-7."""
    a1, a2, a3, a4, a5 = (0.254829592, -0.284496736, 1.421413741,
                          -1.453152027, 1.061405429)
    p = 0.3275911
    az = jnp.abs(z)
    t = 1.0 / (1.0 + p * az)
    poly = ((((a5 * t + a4) * t + a3) * t + a2) * t + a1) * t
    y = 1.0 - poly * jnp.exp(-az * az)
    return jnp.where(z >= 0, y, -y)


def _dw_tap_masks(H, W):
    """(9, H*W) f32 validity mask per 3x3 tap, built at trace time in numpy.

    mask[t][s] == 1 iff spatial position s has an in-bounds neighbour at
    offset (dh, dw) = (t//3-1, t%3-1).  Whenever the mask is 1 the flat index
    s + dh*W + dw lies in [0, H*W), so a circular lane roll never wraps for
    un-masked lanes; masked lanes are zeroed regardless of what wrapped in.
    """
    mask = np.zeros((9, H * W), np.float32)
    hh = np.arange(H)[:, None]
    ww = np.arange(W)[None, :]
    for t in range(9):
        dh, dw = t // 3 - 1, t % 3 - 1
        valid = (hh + dh >= 0) & (hh + dh < H) & (ww + dw >= 0) & (ww + dw < W)
        mask[t] = valid.reshape(-1).astype(np.float32)
    return mask


@jax.jit
def ffblock_forward(x, params):
    """FFBlock.forward: a0*x + a1*FeedForward(CustomLayerNorm(x)). NCHW in/out."""
    N, C, H, W = x.shape
    S = H * W
    C2 = params["in_w"].shape[0]            # 2 * hidden_features
    hidden = C2 // 2
    NC, NC2, NH = N * C, N * C2, N * hidden

    # ------------------------------------------------------------------ glue
    a0 = params["skip"][0]
    a1 = params["skip"][1]

    eyeN = jnp.eye(N, dtype=jnp.float32)
    ones_cc = jnp.ones((C, C), jnp.float32)
    A_mean = jnp.kron(eyeN, ones_cc / C)          # (NC, NC): per-image channel mean
    B_var = jnp.kron(eyeN, ones_cc / (C - 1))     # (NC, NC): unbiased per-image var

    # Permute the stacked hidden (N*C2) channel axis so rows [0, NH) are the
    # GELU branch and rows [NH, 2NH) the gate branch of *each* image ->
    # the in-kernel chunk() becomes two 8-aligned static row slices.
    perm = np.empty(NC2, np.int64)
    for n in range(N):
        for j in range(hidden):
            perm[n * hidden + j] = n * C2 + j
            perm[NH + n * hidden + j] = n * C2 + hidden + j

    w_in_bd = jnp.kron(eyeN, params["in_w"].reshape(C2, C))[perm, :]     # (NC2, NC)
    b_in_st = jnp.tile(params["in_b"].reshape(C2), (N,))[perm]           # (NC2,)
    w_dw_st = jnp.tile(params["dw_w"].reshape(C2, 9), (N, 1))[perm, :]   # (NC2, 9)
    b_dw_st = jnp.tile(params["dw_b"].reshape(C2), (N,))[perm]           # (NC2,)
    w_out_bd = jnp.kron(eyeN, params["out_w"].reshape(C, hidden)) * a1   # (NC, NH), a1 folded
    b_out_st = jnp.tile(params["out_b"].reshape(C), (N,)) * a1           # (NC,)
    ln_st = jnp.tile(params["ln_w"].reshape(C), (N,))                    # (NC,)

    masks = _dw_tap_masks(H, W)                                          # (9, S) const

    # ---- ONE packed, lane-dense parameter/mask buffer (single DMA stream).
    R = max(NC2, NC, 9)
    R = (R + 7) // 8 * 8
    PW = S + 128                     # masks occupy cols [0, S); params after.
    A_C = S
    B_C = A_C + NC
    WIN_C = B_C + NC
    BIN_C = WIN_C + NC
    WDW_C = BIN_C + 1
    BDW_C = WDW_C + 9
    WOUT_C = BDW_C + 1
    BOUT_C = WOUT_C + NH
    LN_C = BOUT_C + 1
    A0_C = LN_C + 1
    assert A0_C + 1 <= PW, "packed parameter buffer too narrow"

    pk = jnp.zeros((R, PW), jnp.float32)
    pk = pk.at[0:9, 0:S].set(jnp.asarray(masks))
    pk = pk.at[0:NC, A_C:A_C + NC].set(A_mean)
    pk = pk.at[0:NC, B_C:B_C + NC].set(B_var)
    pk = pk.at[0:NC2, WIN_C:WIN_C + NC].set(w_in_bd)
    pk = pk.at[0:NC2, BIN_C].set(b_in_st)
    pk = pk.at[0:NC2, WDW_C:WDW_C + 9].set(w_dw_st)
    pk = pk.at[0:NC2, BDW_C].set(b_dw_st)
    pk = pk.at[0:NC, WOUT_C:WOUT_C + NH].set(w_out_bd)
    pk = pk.at[0:NC, BOUT_C].set(b_out_st)
    pk = pk.at[0:NC, LN_C].set(ln_st)
    pk = pk.at[0, A0_C].set(a0)

    # NCHW is channel-major, so folding batch into sublanes is a pure
    # metadata reshape (no transpose, no extra HBM pass).
    x2d = x.reshape(NC, S)

    def kernel(x_ref, p_ref, o_ref):
        xv = x_ref[...]                                             # (NC, S) f32

        # ---- CustomLayerNorm: per-image unbiased channel variance via tiny
        #      block-diagonal MXU matmuls (keeps stats per image despite the
        #      batch being folded into sublanes), then per-channel scale.
        mean = jnp.dot(p_ref[0:NC, A_C:A_C + NC], xv,
                       preferred_element_type=jnp.float32)          # (NC, S)
        var = jnp.dot(p_ref[0:NC, B_C:B_C + NC], (xv - mean) ** 2,
                      preferred_element_type=jnp.float32)           # (NC, S)
        xn = xv * lax.rsqrt(var + 1e-5) * p_ref[0:NC, LN_C:LN_C + 1]

        # ---- project_in (1x1 conv, C -> C2 per image) on the MXU.
        h = jnp.dot(p_ref[0:NC2, WIN_C:WIN_C + NC], xn,
                    preferred_element_type=jnp.float32)              # (NC2, S)
        h = h + p_ref[0:NC2, BIN_C:BIN_C + 1]

        # ---- depthwise 3x3, stride 1, pad 1: centre tap unmasked, the other
        #      8 taps as XLU lane rolls x boundary mask x per-channel weight.
        d = h * p_ref[0:NC2, WDW_C + 4:WDW_C + 5] + p_ref[0:NC2, BDW_C:BDW_C + 1]
        for t in range(9):
            if t == 4:
                continue
            dh, dw = t // 3 - 1, t % 3 - 1
            off = dh * W + dw
            rolled = pltpu.roll(h, shift=(-off) % S, axis=1)         # h[s + off]
            d = d + (rolled * p_ref[t:t + 1, 0:S]) \
                    * p_ref[0:NC2, WDW_C + t:WDW_C + t + 1]

        # ---- gated exact-erf GELU (rows pre-permuted: first NH = GELU branch).
        x1 = d[0:NH, :]
        x2 = d[NH:2 * NH, :]
        gated = 0.5 * x1 * (1.0 + _erf_f32(x1 * 0.7071067811865476)) * x2

        # ---- project_out (hidden -> C per image, a1 already folded in) + skip.
        y = jnp.dot(p_ref[0:NC, WOUT_C:WOUT_C + NH], gated,
                    preferred_element_type=jnp.float32)              # (NC, S)
        y = y + p_ref[0:NC, BOUT_C:BOUT_C + 1]
        out = p_ref[0:1, A0_C:A0_C + 1] * xv + y
        o_ref[...] = out.astype(o_ref.dtype)

    out2d = pl.pallas_call(
        kernel,
        out_shape=jax.ShapeDtypeStruct((NC, S), x.dtype),
        in_specs=[pl.BlockSpec(memory_space=pltpu.MemorySpace.VMEM),
                  pl.BlockSpec(memory_space=pltpu.MemorySpace.VMEM)],
        out_specs=pl.BlockSpec(memory_space=pltpu.MemorySpace.VMEM),
    )(x2d, pk)

    return out2d.reshape(N, C, H, W)


def _reference(x, params):
    """Plain-JAX reference of FFBlock.forward for validation."""
    C = x.shape[1]
    C2 = params["in_w"].shape[0]
    sigma = jnp.var(x, axis=1, keepdims=True, ddof=1)
    xn = x / jnp.sqrt(sigma + 1e-5)
    xn = xn * params["ln_w"].reshape(1, C, 1, 1)
    h = lax.conv_general_dilated(
        xn, params["in_w"], (1, 1), "VALID",
        dimension_numbers=("NCHW", "OIHW", "NCHW"),
        precision=lax.Precision.HIGHEST)
    h = h + params["in_b"].reshape(1, -1, 1, 1)
    d = lax.conv_general_dilated(
        h, params["dw_w"], (1, 1), ((1, 1), (1, 1)),
        dimension_numbers=("NCHW", "OIHW", "NCHW"),
        feature_group_count=C2, precision=lax.Precision.HIGHEST)
    d = d + params["dw_b"].reshape(1, -1, 1, 1)
    x1, x2 = jnp.split(d, 2, axis=1)
    g = jax.nn.gelu(x1, approximate=False) * x2
    y = lax.conv_general_dilated(
        g, params["out_w"], (1, 1), "VALID",
        dimension_numbers=("NCHW", "OIHW", "NCHW"),
        precision=lax.Precision.HIGHEST)
    y = y + params["out_b"].reshape(1, -1, 1, 1)
    a = params["skip"]
    return a[0] * x + a[1] * y


if __name__ == "__main__":
    # FFBlock(dim=4, ffn_expansion_factor=2, bias=True); batch=2, spatial=16.
    dim, ffn_factor = 4, 2
    N, H, W = 2, 16, 16
    hidden = int(dim * ffn_factor)
    C2 = 2 * hidden

    key = jax.random.PRNGKey(0)
    ks = jax.random.split(key, 8)
    x = jax.random.normal(ks[0], (N, dim, H, W), dtype=jnp.float32)
    params = {
        "ln_w": 1.0 + 0.3 * jax.random.normal(ks[1], (dim, 1, 1, 1), jnp.float32),
        "in_w": 0.2 * jax.random.normal(ks[2], (C2, dim, 1, 1), jnp.float32),
        "in_b": 0.1 * jax.random.normal(ks[3], (C2,), jnp.float32),
        "dw_w": 0.2 * jax.random.normal(ks[4], (C2, 1, 3, 3), jnp.float32),
        "dw_b": 0.1 * jax.random.normal(ks[5], (C2,), jnp.float32),
        "out_w": 0.2 * jax.random.normal(ks[6], (dim, hidden, 1, 1), jnp.float32),
        "out_b": 0.1 * jax.random.normal(ks[7], (dim,), jnp.float32),
        "skip": jnp.array([0.5, 0.5], jnp.float32),   # module init values
    }

    out = jax.block_until_ready(ffblock_forward(x, params))
    assert out.shape == (N, dim, H, W), out.shape

    ref = jax.block_until_ready(_reference(x, params))
    max_err = float(jnp.max(jnp.abs(out - ref)))
    # 2e-3 tolerance leaves margin for MXU f32 rounding; structural errors
    # (wrong tap/mask/permutation/statistics) would be orders of magnitude larger.
    assert jnp.allclose(out, ref, rtol=2e-3, atol=2e-3), f"mismatch vs reference: {max_err}"

    print("KERNEL_OK")
</pallas_src>

<mosaic_0001>
module attributes {stable_mosaic.version = 11 : i64} {
  func.func @kernel(%arg0: memref<8x256xf32, #tpu.memory_space<vmem>>, %arg1: memref<32x384xf32, #tpu.memory_space<vmem>>, %arg2: memref<8x256xf32, #tpu.memory_space<vmem>>) attributes {dimension_semantics = [], scalar_prefetch = 0 : i64, scratch_operands = 0 : i64, tpu.core_type = #tpu.core_type<tc>} {
    %c0 = arith.constant 0 : index
    %c0_0 = arith.constant 0 : index
    %0 = vector.load %arg0[%c0, %c0_0] : memref<8x256xf32, #tpu.memory_space<vmem>>, vector<8x256xf32>
    %c0_1 = arith.constant 0 : index
    %c256 = arith.constant 256 : index
    %1 = vector.load %arg1[%c0_1, %c256] : memref<32x384xf32, #tpu.memory_space<vmem>>, vector<8x8xf32>
    %cst = arith.constant dense<0.000000e+00> : vector<8x256xf32>
    %2 = tpu.matmul %1, %0, %cst {dimension_numbers = #tpu.dot_dimension_numbers<[1], [0], [0], [1], [0, 0, 1, 1], [], []>} : vector<8x8xf32>, vector<8x256xf32>, vector<8x256xf32> -> vector<8x256xf32>
    %c0_2 = arith.constant 0 : index
    %c264 = arith.constant 264 : index
    %3 = vector.load %arg1[%c0_2, %c264] : memref<32x384xf32, #tpu.memory_space<vmem>>, vector<8x8xf32>
    %4 = arith.subf %0, %2 : vector<8x256xf32>
    %5 = arith.mulf %4, %4 : vector<8x256xf32>
    %cst_3 = arith.constant dense<0.000000e+00> : vector<8x256xf32>
    %6 = tpu.matmul %3, %5, %cst_3 {dimension_numbers = #tpu.dot_dimension_numbers<[1], [0], [0], [1], [0, 0, 1, 1], [], []>} : vector<8x8xf32>, vector<8x256xf32>, vector<8x256xf32> -> vector<8x256xf32>
    %cst_4 = arith.constant 9.99999974E-6 : f32
    %7 = vector.broadcast %cst_4 : f32 to vector<8x256xf32>
    %8 = arith.addf %6, %7 : vector<8x256xf32>
    %9 = math.rsqrt %8 : vector<8x256xf32>
    %10 = arith.mulf %0, %9 : vector<8x256xf32>
    %c0_5 = arith.constant 0 : index
    %c308 = arith.constant 308 : index
    %11 = vector.load %arg1[%c0_5, %c308] : memref<32x384xf32, #tpu.memory_space<vmem>>, vector<8x1xf32>
    %12 = vector.broadcast %11 : vector<8x1xf32> to vector<8x256xf32>
    %13 = arith.mulf %10, %12 : vector<8x256xf32>
    %c0_6 = arith.constant 0 : index
    %c272 = arith.constant 272 : index
    %14 = vector.load %arg1[%c0_6, %c272] : memref<32x384xf32, #tpu.memory_space<vmem>>, vector<32x8xf32>
    %cst_7 = arith.constant dense<0.000000e+00> : vector<32x256xf32>
    %15 = tpu.matmul %14, %13, %cst_7 {dimension_numbers = #tpu.dot_dimension_numbers<[1], [0], [0], [1], [0, 0, 1, 1], [], []>} : vector<32x8xf32>, vector<8x256xf32>, vector<32x256xf32> -> vector<32x256xf32>
    %c0_8 = arith.constant 0 : index
    %c280 = arith.constant 280 : index
    %16 = vector.load %arg1[%c0_8, %c280] : memref<32x384xf32, #tpu.memory_space<vmem>>, vector<32x1xf32>
    %17 = vector.broadcast %16 : vector<32x1xf32> to vector<32x256xf32>
    %18 = arith.addf %15, %17 : vector<32x256xf32>
    %c0_9 = arith.constant 0 : index
    %c285 = arith.constant 285 : index
    %19 = vector.load %arg1[%c0_9, %c285] : memref<32x384xf32, #tpu.memory_space<vmem>>, vector<32x1xf32>
    %20 = vector.broadcast %19 : vector<32x1xf32> to vector<32x256xf32>
    %21 = arith.mulf %18, %20 : vector<32x256xf32>
    %c0_10 = arith.constant 0 : index
    %c290 = arith.constant 290 : index
    %22 = vector.load %arg1[%c0_10, %c290] : memref<32x384xf32, #tpu.memory_space<vmem>>, vector<32x1xf32>
    %23 = vector.broadcast %22 : vector<32x1xf32> to vector<32x256xf32>
    %24 = arith.addf %21, %23 : vector<32x256xf32>
    %c17_i32 = arith.constant 17 : i32
    %25 = tpu.dynamic_rotate %18 by %c17_i32 dim 1 : vector<32x256xf32>, i32 -> vector<32x256xf32>
    %c0_11 = arith.constant 0 : index
    %c0_12 = arith.constant 0 : index
    %26 = vector.load %arg1[%c0_11, %c0_12] : memref<32x384xf32, #tpu.memory_space<vmem>>, vector<1x256xf32>
    %27 = vector.broadcast %26 : vector<1x256xf32> to vector<32x256xf32>
    %28 = arith.mulf %25, %27 : vector<32x256xf32>
    %c0_13 = arith.constant 0 : index
    %c281 = arith.constant 281 : index
    %29 = vector.load %arg1[%c0_13, %c281] : memref<32x384xf32, #tpu.memory_space<vmem>>, vector<32x1xf32>
    %30 = vector.broadcast %29 : vector<32x1xf32> to vector<32x256xf32>
    %31 = arith.mulf %28, %30 : vector<32x256xf32>
    %32 = arith.addf %24, %31 : vector<32x256xf32>
    %c16_i32 = arith.constant 16 : i32
    %33 = tpu.dynamic_rotate %18 by %c16_i32 dim 1 : vector<32x256xf32>, i32 -> vector<32x256xf32>
    %c1 = arith.constant 1 : index
    %c0_14 = arith.constant 0 : index
    %34 = vector.load %arg1[%c1, %c0_14] : memref<32x384xf32, #tpu.memory_space<vmem>>, vector<1x256xf32>
    %35 = vector.broadcast %34 : vector<1x256xf32> to vector<32x256xf32>
    %36 = arith.mulf %33, %35 : vector<32x256xf32>
    %c0_15 = arith.constant 0 : index
    %c282 = arith.constant 282 : index
    %37 = vector.load %arg1[%c0_15, %c282] : memref<32x384xf32, #tpu.memory_space<vmem>>, vector<32x1xf32>
    %38 = vector.broadcast %37 : vector<32x1xf32> to vector<32x256xf32>
    %39 = arith.mulf %36, %38 : vector<32x256xf32>
    %40 = arith.addf %32, %39 : vector<32x256xf32>
    %c15_i32 = arith.constant 15 : i32
    %41 = tpu.dynamic_rotate %18 by %c15_i32 dim 1 : vector<32x256xf32>, i32 -> vector<32x256xf32>
    %c2 = arith.constant 2 : index
    %c0_16 = arith.constant 0 : index
    %42 = vector.load %arg1[%c2, %c0_16] : memref<32x384xf32, #tpu.memory_space<vmem>>, vector<1x256xf32>
    %43 = vector.broadcast %42 : vector<1x256xf32> to vector<32x256xf32>
    %44 = arith.mulf %41, %43 : vector<32x256xf32>
    %c0_17 = arith.constant 0 : index
    %c283 = arith.constant 283 : index
    %45 = vector.load %arg1[%c0_17, %c283] : memref<32x384xf32, #tpu.memory_space<vmem>>, vector<32x1xf32>
    %46 = vector.broadcast %45 : vector<32x1xf32> to vector<32x256xf32>
    %47 = arith.mulf %44, %46 : vector<32x256xf32>
    %48 = arith.addf %40, %47 : vector<32x256xf32>
    %c1_i32 = arith.constant 1 : i32
    %49 = tpu.dynamic_rotate %18 by %c1_i32 dim 1 : vector<32x256xf32>, i32 -> vector<32x256xf32>
    %c3 = arith.constant 3 : index
    %c0_18 = arith.constant 0 : index
    %50 = vector.load %arg1[%c3, %c0_18] : memref<32x384xf32, #tpu.memory_space<vmem>>, vector<1x256xf32>
    %51 = vector.broadcast %50 : vector<1x256xf32> to vector<32x256xf32>
    %52 = arith.mulf %49, %51 : vector<32x256xf32>
    %c0_19 = arith.constant 0 : index
    %c284 = arith.constant 284 : index
    %53 = vector.load %arg1[%c0_19, %c284] : memref<32x384xf32, #tpu.memory_space<vmem>>, vector<32x1xf32>
    %54 = vector.broadcast %53 : vector<32x1xf32> to vector<32x256xf32>
    %55 = arith.mulf %52, %54 : vector<32x256xf32>
    %56 = arith.addf %48, %55 : vector<32x256xf32>
    %c255_i32 = arith.constant 255 : i32
    %57 = tpu.dynamic_rotate %18 by %c255_i32 dim 1 : vector<32x256xf32>, i32 -> vector<32x256xf32>
    %c5 = arith.constant 5 : index
    %c0_20 = arith.constant 0 : index
    %58 = vector.load %arg1[%c5, %c0_20] : memref<32x384xf32, #tpu.memory_space<vmem>>, vector<1x256xf32>
    %59 = vector.broadcast %58 : vector<1x256xf32> to vector<32x256xf32>
    %60 = arith.mulf %57, %59 : vector<32x256xf32>
    %c0_21 = arith.constant 0 : index
    %c286 = arith.constant 286 : index
    %61 = vector.load %arg1[%c0_21, %c286] : memref<32x384xf32, #tpu.memory_space<vmem>>, vector<32x1xf32>
    %62 = vector.broadcast %61 : vector<32x1xf32> to vector<32x256xf32>
    %63 = arith.mulf %60, %62 : vector<32x256xf32>
    %64 = arith.addf %56, %63 : vector<32x256xf32>
    %c241_i32 = arith.constant 241 : i32
    %65 = tpu.dynamic_rotate %18 by %c241_i32 dim 1 : vector<32x256xf32>, i32 -> vector<32x256xf32>
    %c6 = arith.constant 6 : index
    %c0_22 = arith.constant 0 : index
    %66 = vector.load %arg1[%c6, %c0_22] : memref<32x384xf32, #tpu.memory_space<vmem>>, vector<1x256xf32>
    %67 = vector.broadcast %66 : vector<1x256xf32> to vector<32x256xf32>
    %68 = arith.mulf %65, %67 : vector<32x256xf32>
    %c0_23 = arith.constant 0 : index
    %c287 = arith.constant 287 : index
    %69 = vector.load %arg1[%c0_23, %c287] : memref<32x384xf32, #tpu.memory_space<vmem>>, vector<32x1xf32>
    %70 = vector.broadcast %69 : vector<32x1xf32> to vector<32x256xf32>
    %71 = arith.mulf %68, %70 : vector<32x256xf32>
    %72 = arith.addf %64, %71 : vector<32x256xf32>
    %c240_i32 = arith.constant 240 : i32
    %73 = tpu.dynamic_rotate %18 by %c240_i32 dim 1 : vector<32x256xf32>, i32 -> vector<32x256xf32>
    %c7 = arith.constant 7 : index
    %c0_24 = arith.constant 0 : index
    %74 = vector.load %arg1[%c7, %c0_24] : memref<32x384xf32, #tpu.memory_space<vmem>>, vector<1x256xf32>
    %75 = vector.broadcast %74 : vector<1x256xf32> to vector<32x256xf32>
    %76 = arith.mulf %73, %75 : vector<32x256xf32>
    %c0_25 = arith.constant 0 : index
    %c288 = arith.constant 288 : index
    %77 = vector.load %arg1[%c0_25, %c288] : memref<32x384xf32, #tpu.memory_space<vmem>>, vector<32x1xf32>
    %78 = vector.broadcast %77 : vector<32x1xf32> to vector<32x256xf32>
    %79 = arith.mulf %76, %78 : vector<32x256xf32>
    %80 = arith.addf %72, %79 : vector<32x256xf32>
    %c239_i32 = arith.constant 239 : i32
    %81 = tpu.dynamic_rotate %18 by %c239_i32 dim 1 : vector<32x256xf32>, i32 -> vector<32x256xf32>
    %c8 = arith.constant 8 : index
    %c0_26 = arith.constant 0 : index
    %82 = vector.load %arg1[%c8, %c0_26] : memref<32x384xf32, #tpu.memory_space<vmem>>, vector<1x256xf32>
    %83 = vector.broadcast %82 : vector<1x256xf32> to vector<32x256xf32>
    %84 = arith.mulf %81, %83 : vector<32x256xf32>
    %c0_27 = arith.constant 0 : index
    %c289 = arith.constant 289 : index
    %85 = vector.load %arg1[%c0_27, %c289] : memref<32x384xf32, #tpu.memory_space<vmem>>, vector<32x1xf32>
    %86 = vector.broadcast %85 : vector<32x1xf32> to vector<32x256xf32>
    %87 = arith.mulf %84, %86 : vector<32x256xf32>
    %88 = arith.addf %80, %87 : vector<32x256xf32>
    %89 = vector.extract_strided_slice %88 {offsets = [0, 0], sizes = [16, 256], strides = [1, 1]} : vector<32x256xf32> to vector<16x256xf32>
    %90 = vector.extract_strided_slice %88 {offsets = [16, 0], sizes = [16, 256], strides = [1, 1]} : vector<32x256xf32> to vector<16x256xf32>
    %cst_28 = arith.constant 5.000000e-01 : f32
    %91 = vector.broadcast %cst_28 : f32 to vector<16x256xf32>
    %92 = arith.mulf %91, %89 : vector<16x256xf32>
    %cst_29 = arith.constant 0.707106769 : f32
    %93 = vector.broadcast %cst_29 : f32 to vector<16x256xf32>
    %94 = arith.mulf %89, %93 : vector<16x256xf32>
    %95 = math.absf %94 : vector<16x256xf32>
    %cst_30 = arith.constant 0.327591091 : f32
    %96 = vector.broadcast %cst_30 : f32 to vector<16x256xf32>
    %97 = arith.mulf %96, %95 : vector<16x256xf32>
    %cst_31 = arith.constant 1.000000e+00 : f32
    %98 = vector.broadcast %cst_31 : f32 to vector<16x256xf32>
    %99 = arith.addf %98, %97 : vector<16x256xf32>
    %cst_32 = arith.constant 1.000000e+00 : f32
    %100 = vector.broadcast %cst_32 : f32 to vector<16x256xf32>
    %101 = arith.divf %100, %99 : vector<16x256xf32>
    %cst_33 = arith.constant 1.06140542 : f32
    %102 = vector.broadcast %cst_33 : f32 to vector<16x256xf32>
    %103 = arith.mulf %102, %101 : vector<16x256xf32>
    %cst_34 = arith.constant -1.45315206 : f32
    %104 = vector.broadcast %cst_34 : f32 to vector<16x256xf32>
    %105 = arith.addf %103, %104 : vector<16x256xf32>
    %106 = arith.mulf %105, %101 : vector<16x256xf32>
    %cst_35 = arith.constant 1.42141378 : f32
    %107 = vector.broadcast %cst_35 : f32 to vector<16x256xf32>
    %108 = arith.addf %106, %107 : vector<16x256xf32>
    %109 = arith.mulf %108, %101 : vector<16x256xf32>
    %cst_36 = arith.constant -0.284496725 : f32
    %110 = vector.broadcast %cst_36 : f32 to vector<16x256xf32>
    %111 = arith.addf %109, %110 : vector<16x256xf32>
    %112 = arith.mulf %111, %101 : vector<16x256xf32>
    %cst_37 = arith.constant 0.254829586 : f32
    %113 = vector.broadcast %cst_37 : f32 to vector<16x256xf32>
    %114 = arith.addf %112, %113 : vector<16x256xf32>
    %115 = arith.mulf %114, %101 : vector<16x256xf32>
    %cst_38 = arith.constant 0.000000e+00 : f32
    %116 = vector.broadcast %cst_38 : f32 to vector<16x256xf32>
    %117 = arith.subf %116, %95 : vector<16x256xf32>
    %118 = arith.mulf %117, %95 : vector<16x256xf32>
    %119 = math.exp %118 : vector<16x256xf32>
    %120 = arith.mulf %115, %119 : vector<16x256xf32>
    %cst_39 = arith.constant 1.000000e+00 : f32
    %121 = vector.broadcast %cst_39 : f32 to vector<16x256xf32>
    %122 = arith.subf %121, %120 : vector<16x256xf32>
    %cst_40 = arith.constant 0.000000e+00 : f32
    %123 = vector.broadcast %cst_40 : f32 to vector<16x256xf32>
    %124 = arith.cmpf oge, %94, %123 : vector<16x256xf32>
    %cst_41 = arith.constant 0.000000e+00 : f32
    %125 = vector.broadcast %cst_41 : f32 to vector<16x256xf32>
    %126 = arith.subf %125, %122 : vector<16x256xf32>
    %127 = arith.select %124, %122, %126 : vector<16x256xi1>, vector<16x256xf32>
    %cst_42 = arith.constant 1.000000e+00 : f32
    %128 = vector.broadcast %cst_42 : f32 to vector<16x256xf32>
    %129 = arith.addf %128, %127 : vector<16x256xf32>
    %130 = arith.mulf %92, %129 : vector<16x256xf32>
    %131 = arith.mulf %130, %90 : vector<16x256xf32>
    %c0_43 = arith.constant 0 : index
    %c291 = arith.constant 291 : index
    %132 = vector.load %arg1[%c0_43, %c291] : memref<32x384xf32, #tpu.memory_space<vmem>>, vector<8x16xf32>
    %cst_44 = arith.constant dense<0.000000e+00> : vector<8x256xf32>
    %133 = tpu.matmul %132, %131, %cst_44 {dimension_numbers = #tpu.dot_dimension_numbers<[1], [0], [0], [1], [0, 0, 1, 1], [], []>} : vector<8x16xf32>, vector<16x256xf32>, vector<8x256xf32> -> vector<8x256xf32>
    %c0_45 = arith.constant 0 : index
    %c307 = arith.constant 307 : index
    %134 = vector.load %arg1[%c0_45, %c307] : memref<32x384xf32, #tpu.memory_space<vmem>>, vector<8x1xf32>
    %135 = vector.broadcast %134 : vector<8x1xf32> to vector<8x256xf32>
    %136 = arith.addf %133, %135 : vector<8x256xf32>
    %c0_46 = arith.constant 0 : index
    %c309 = arith.constant 309 : index
    %137 = vector.load %arg1[%c0_46, %c309] : memref<32x384xf32, #tpu.memory_space<vmem>>, vector<1x1xf32>
    %138 = vector.broadcast %137 : vector<1x1xf32> to vector<8x256xf32>
    %139 = arith.mulf %138, %0 : vector<8x256xf32>
    %140 = arith.addf %139, %136 : vector<8x256xf32>
    %c0_47 = arith.constant 0 : index
    %c0_48 = arith.constant 0 : index
    %141 = vector.load %arg2[%c0_47, %c0_48] : memref<8x256xf32, #tpu.memory_space<vmem>>, vector<8x256xf32>
    tpu.vector_store %arg2[%c0_47, %c0_48], %140 {strides = array<i32>} : memref<8x256xf32, #tpu.memory_space<vmem>>, vector<8x256xf32>,
    return
  }
}

</mosaic_0001>

<bundles_post_ra>
// kernel: tile.26
= control target key start
LH: loop header
LB: loop body
LE: loop exit
PB: predicated region body
PF: predicated region fallthrough
CT: control target
= control target key end

     0   :  { %s22_s0 = inlined_call_operand.vmem [shape: f32[16], index: 0, kind: input, shape index: {}]   ;;  %s23_s1 = inlined_call_operand.vmem [shape: f32[2,16], index: 1, kind: output, shape index: {}]  }
   0x1   :  { %v4_v0 = vld [vmem:[%s22_s0] ss:$0 sm:$0xff] }
   0x2   :  { %5 = vst [vmem:[%s23_s1] sm:$0x3] %v4_v0 }

// kernel: tile.27
= control target key start
LH: loop header
LB: loop body
LE: loop exit
PB: predicated region body
PF: predicated region fallthrough
CT: control target
= control target key end

     0   :  { %vm8_vm0 = vcmask 130048   ;;  %vm14_vm1 = vcmask 261248   ;;  %s42_s0 = inlined_call_operand.vmem [shape: f32[2,16], index: 0, kind: input, shape index: {}]   ;;  %s43_s1 = inlined_call_operand.vmem [shape: f32[32], index: 1, kind: output, shape index: {}]  }
   0x1   :  { %v5_v0 = vld [vmem:[%s42_s0] sm:$0x3]  ;;  %s25_s0 = smov 16  }
   0x2   :  { %6 = vst [vmem:[#allocation1] sm:$0x3] %v5_v0 }
   0x9   :  { %v11_v1 = vld [vmem:[#allocation1 + $0x1] sm:$0x1]   ;;  %v7_v2 = vld [vmem:[#allocation1] sm:$0x1]  }
   0xa   :  { %12 = vrot.lane.b32.xlu0 %v11_v1, %s25_s0  ;;  %9 = vst.msk [vmem:[#allocation0] sm:$0x1] %vm8_vm0, %v7_v2  }
  0x7c   :  { %v13_v3 = vpop.permute.xlu0 %12  }
  0x7d   :  { %15 = vst.msk [vmem:[#allocation0] sm:$0x1] %vm14_vm1, %v13_v3  }
  0x84   :  { %v20_v4 = vld [vmem:[#allocation0] sm:$0x1] }
  0x85   :  { %23 = vst [vmem:[%s43_s1] sm:$0x1] %v20_v4 }

// kernel: ffblock_forward.1
= control target key start
LH: loop header
LB: loop body
LE: loop exit
PB: predicated region body
PF: predicated region fallthrough
CT: control target
= control target key end

     0   :  { %v1279_v2 = vmov 0.0   ;;  %vm14_vm0 = vcmask 64512   ;;  %s1280_s15 = smov 120   ;;  %v1281_v4 = vmov 52   ;;  %s1282_s16 = smov 112   ;;  %v1283_v15 = vmov 24   ;;  %s2270_s0 = inlined_call_operand.vmem [shape: f32[8,256], index: 0, kind: input, shape index: {}]   ;;  %s2271_s1 = inlined_call_operand.vmem [shape: f32[32,384], index: 1, kind: input, shape index: {}]   ;;  %s2272_s2 = inlined_call_operand.vmem [shape: f32[8,256], index: 2, kind: output, shape index: {}]  }
   0x1   :  { %v1322_v0 = vld [vmem:[%s2270_s0 + $0x8] sm:$0xff]  ;;  %v1327_v1 = vld [vmem:[%s2270_s0] sm:$0xff]  ;;  %82 = vmatprep.mubr.f32.mxu1 %v1279_v2  ;;  %v1333_v3 = vld [vmem:[%s2271_s1 + $0x10] sm:$0xff]  ;;  %282 = vmatprep.mubr.f32.mxu0 %v1279_v2  ;;  %v1284_v16 = vmov 26   ;;  %v1285_v17 = vmov 29   ;;  %v1286_v18 = vmov 30  }
   0x2   :  { %48 = vmatprep.subr.mxu1 %v1322_v0  ;;  %93 = vrot.lane.b32.xlu0 %v1333_v3, %s1280_s15  ;;  %v1348_v5 = vld [vmem:[%s2271_s1 + $0x28] sm:$0xff]  ;;  %v1353_v6 = vld [vmem:[%s2271_s1 + $0x58] sm:$0xff]  ;;  %v1360_v7 = vld [vmem:[%s2271_s1 + $0x40] sm:$0xff]  ;;  %v1287_v19 = vmov 34   ;;  %v1288_v20 = vmov 33   ;;  %v1289_v21 = vmov 25  }
   0x3   :  { %49 = vmatpush1.msra.mxu1 %v1327_v1  ;;  %1227 = vset.pattern.permute.xlu0 %v1281_v4  ;;  %v1290_v22 = vmov 27   ;;  %v1291_v23 = vmov 28   ;;  %v1292_v24 = vmov 31   ;;  %v1293_v25 = vmov 32   ;;  %s1294_s23 = smov 16   ;;  %s1295_s24 = smov 17  }
   0x4   :  { %1188 = vmatmul.mubr.msk.f32.vlgmr.msra.gmra.mxu1 %vm14_vm0, %v1333_v3  ;;  %202 = vrot.lane.b32.xlu1 %v1333_v3, %s1282_s16  ;;  %s1296_s25 = smov 127   ;;  %s1297_s26 = smov 15   ;;  %vm1098_vm13 = vcmask 130048  }
   0x5   :  { %161 = vmatprep.mubr.f32.mxu1 %v1279_v2  ;;  %1228 = vset.pattern.permute.xlu1 %v1283_v15  ;;  %s1298_s27 = smov 1   ;;  %s1299_s28 = smov 113  }
   0x6   :  { %173 = vperm.xlu0 %1227, %v1333_v3   ;;  %s1300_s29 = smov 111   ;;  %s1301_s30 = smov 93  }
   0x8   :  { %204 = vrot.lane.b32.xlu1 %v1348_v5, %s1282_s16 }
   0xa   :  { %208 = vrot.lane.b32.xlu0 %v1353_v6, %s1282_s16 }
   0xb   :  { %1229 = vset.pattern.permute.xlu0 %v1283_v15 }
   0xc   :  { %206 = vrot.lane.b32.xlu1 %v1360_v7, %s1282_s16 }
   0xe   :  { %184 = vperm.xlu0 %1229, %v1333_v3  }
  0x10   :  { %189 = vperm.xlu1 %1228, %v1348_v5  }
  0x12   :  { %1233 = vset.pattern.permute.xlu0 %v1284_v16 }
  0x13   :  { %485 = vperm.xlu0 %1233, %v1348_v5  }
  0x14   :  { %199 = vperm.xlu1 %1228, %v1353_v6  }
  0x17   :  { %481 = vperm.xlu0 %1233, %v1333_v3  }
  0x18   :  { %194 = vperm.xlu1 %1228, %v1360_v7  }
  0x1b   :  { %1236 = vset.pattern.permute.xlu0 %v1286_v18 }
  0x1c   :  { %1230 = vset.pattern.permute.xlu1 %v1285_v17  ;;  %719 = vperm.xlu0 %1236, %v1348_v5  }
  0x1d   :  { %308 = vperm.xlu1 %1230, %v1333_v3  }
  0x20   :  { %715 = vperm.xlu0 %1236, %v1333_v3  }
  0x21   :  { %1231 = vset.pattern.permute.xlu1 %v1287_v19 }
  0x22   :  { %336 = vperm.xlu1 %1231, %v1348_v5  }
  0x24   :  { %1239 = vset.pattern.permute.xlu0 %v1288_v20 }
  0x25   :  { %953 = vperm.xlu0 %1239, %v1348_v5  }
  0x26   :  { %332 = vperm.xlu1 %1231, %v1333_v3  }
  0x29   :  { %949 = vperm.xlu0 %1239, %v1333_v3  }
  0x2a   :  { %1232 = vset.pattern.permute.xlu1 %v1289_v21 }
  0x2b   :  { %403 = vperm.xlu1 %1232, %v1333_v3  }
  0x2d   :  { %1240 = vset.pattern.permute.xlu0 %v1285_v17 }
  0x2e   :  { %312 = vperm.xlu0 %1240, %v1348_v5  }
  0x2f   :  { %1234 = vset.pattern.permute.xlu1 %v1290_v22 }
  0x30   :  { %563 = vperm.xlu1 %1234, %v1348_v5  }
  0x32   :  { %316 = vperm.xlu0 %1240, %v1360_v7  }
  0x34   :  { %1235 = vset.pattern.permute.xlu1 %v1291_v23 }
  0x35   :  { %641 = vperm.xlu1 %1235, %v1348_v5  }
  0x36   :  { %1244 = vset.pattern.permute.xlu0 %v1287_v19 }
  0x37   :  { %340 = vperm.xlu0 %1244, %v1360_v7  }
  0x39   :  { %637 = vperm.xlu1 %1235, %v1333_v3  }
  0x3b   :  { %1245 = vset.pattern.permute.xlu0 %v1289_v21 }
  0x3c   :  { %407 = vperm.xlu0 %1245, %v1348_v5  }
  0x3d   :  { %1237 = vset.pattern.permute.xlu1 %v1292_v24 }
  0x3e   :  { %797 = vperm.xlu1 %1237, %v1348_v5  }
  0x40   :  { %411 = vperm.xlu0 %1245, %v1360_v7  }
  0x42   :  { %1238 = vset.pattern.permute.xlu1 %v1293_v25 }
  0x43   :  { %875 = vperm.xlu1 %1238, %v1348_v5  }
  0x44   :  { %1246 = vset.pattern.permute.xlu0 %v1290_v22 }
  0x45   :  { %559 = vperm.xlu0 %1246, %v1333_v3  }
  0x47   :  { %871 = vperm.xlu1 %1238, %v1333_v3  }
  0x49   :  { %571 = vperm.xlu0 %1246, %v1353_v6  }
  0x4b   :  { %1241 = vset.pattern.permute.xlu1 %v1285_v17 }
  0x4c   :  { %320 = vperm.xlu1 %1241, %v1353_v6  }
  0x4d   :  { %567 = vperm.xlu0 %1246, %v1360_v7  }
  0x50   :  { %1242 = vset.pattern.permute.xlu1 %v1287_v19 }
  0x51   :  { %344 = vperm.xlu1 %1242, %v1353_v6   ;;  %1249 = vset.pattern.permute.xlu0 %v1291_v23 }
  0x52   :  { %645 = vperm.xlu0 %1249, %v1360_v7  }
  0x55   :  { %1243 = vset.pattern.permute.xlu1 %v1289_v21 }
  0x56   :  { %415 = vperm.xlu1 %1243, %v1353_v6   ;;  %1250 = vset.pattern.permute.xlu0 %v1292_v24 }
  0x57   :  { %793 = vperm.xlu0 %1250, %v1333_v3  }
  0x5a   :  { %1247 = vset.pattern.permute.xlu1 %v1284_v16 }
  0x5b   :  { %493 = vperm.xlu1 %1247, %v1353_v6   ;;  %805 = vperm.xlu0 %1250, %v1353_v6  }
  0x5f   :  { %489 = vperm.xlu1 %1247, %v1360_v7   ;;  %801 = vperm.xlu0 %1250, %v1360_v7  }
  0x63   :  { %1248 = vset.pattern.permute.xlu1 %v1291_v23  ;;  %1253 = vset.pattern.permute.xlu0 %v1293_v25 }
  0x64   :  { %649 = vperm.xlu1 %1248, %v1353_v6  }
  0x68   :  { %1251 = vset.pattern.permute.xlu1 %v1286_v18 }
  0x69   :  { %727 = vperm.xlu1 %1251, %v1353_v6  }
  0x6d   :  { %723 = vperm.xlu1 %1251, %v1360_v7  }
  0x71   :  { %1252 = vset.pattern.permute.xlu1 %v1293_v25 }
  0x72   :  { %883 = vperm.xlu1 %1252, %v1353_v6  }
  0x74   :  { %v94_v14 = vpop.permute.xlu0 %93 }
  0x76   :  { %1254 = vset.pattern.permute.xlu1 %v1288_v20  ;;  %v203_v35 = vpop.permute.xlu1 %202 }
  0x7a   :  { %v205_v38 = vpop.permute.xlu1 %204 }
  0x7e   :  { %v207_v39 = vpop.permute.xlu1 %206 }
  0x81   :  { %v174_v33 = vpop.permute.xlu0 %173 }
  0x85   :  { %v209_v40 = vpop.permute.xlu0 %208 }
  0x89   :  { %v185_v44 = vpop.permute.xlu0 %184 }
  0x8b   :  { %v190_v41 = vpop.permute.xlu1 %189 }
  0x8e   :  { %v1440_v51 = vpop.permute.xlu0 %485 }
  0x8f   :  { %v1420_v42 = vpop.permute.xlu1 %199 }
  0x92   :  { %v1452_v53 = vpop.permute.xlu0 %481 }
  0x93   :  { %v1422_v43 = vpop.permute.xlu1 %194 }
  0x97   :  { %v1462_v57 = vpop.permute.xlu0 %719 }
  0x98   :  { %v1430_v47 = vpop.permute.xlu1 %308 }
  0x9b   :  { %v1474_v59 = vpop.permute.xlu0 %715 }
  0x9d   :  { %v1438_v50 = vpop.permute.xlu1 %336 }
  0xa0   :  { %v1482_v61 = vpop.permute.xlu0 %953 }
  0xa1   :  { %v1450_v52 = vpop.permute.xlu1 %332 }
  0xa6   :  { %v1460_v56 = vpop.permute.xlu1 %403 }
  0xab   :  { %v1472_v58 = vpop.permute.xlu1 %563 }
  0xb0   :  { %v1480_v60 = vpop.permute.xlu1 %641 }
  0xb4   :  { %v1492_v63 = vpop.permute.xlu1 %637 }
  0xc4   :  { %v84_v8 = vpop.f32.mrf.mxu1 }
  0xc5   :  { %v89_v9 = vsub.f32 %v1327_v1, %v84_v8 }
  0xc6   :  { %v86_v10 = vpop.f32.mrf.mxu1 }
  0xc7   :  { %v90_v11 = vsub.f32 %v1322_v0, %v86_v10  ;;  %v91_v13 = vmul.f32 %v89_v9, %v89_v9 }
  0xc9   :  { %v92_v12 = vmul.f32 %v90_v11, %v90_v11 }
  0xcb   :  { %127 = vmatprep.subr.mxu1 %v92_v12 }
  0xcc   :  { %128 = vmatpush1.msra.mxu1 %v91_v13 }
  0xcd   :  { %1189 = vmatmul.mubr.msk.f32.vlgmr.msra.gmra.mxu1 %vm14_vm0, %v94_v14 }
  0xce   :  { %1165 = vmatprep.mubr.f32.mxu1 %v1279_v2 }
 0x18d   :  { %v163_v26 = vpop.f32.mrf.mxu1 }
 0x18e   :  { %v164_v27 = vadd.f32 1e-05, %v163_v26 }
 0x18f   :  { %v165_v28 = vpop.f32.mrf.mxu1 }
 0x190   :  { %1257 = vrsqrt.f32 %v164_v27  ;;  %v166_v29 = vadd.f32 1e-05, %v165_v28 }
 0x192   :  { %1259 = vrsqrt.f32 %v166_v29 }
 0x19d   :  { %v1258_v30 = vpop.eup %1257 }
 0x19e   :  { %v170_v32 = vmul.f32 %v1258_v30, %v1327_v1 }
 0x19f   :  { %v1260_v31 = vpop.eup %1259 }
 0x1a0   :  { %v171_v34 = vmul.f32 %v1260_v31, %v1322_v0  ;;  %v176_v37 = vmul.f32 %v174_v33, %v170_v32  ;;  %v1494_v0 = vpop.permute.xlu0 %949 }
 0x1a2   :  { %v177_v36 = vmul.f32 %v174_v33, %v171_v34 }
 0x1a4   :  { %248 = vmatprep.subr.mxu0 %v177_v36  ;;  %v1504_v4 = vpop.permute.xlu0 %312 }
 0x1a5   :  { %249 = vmatpush1.msra.mxu0 %v176_v37 }
 0x1a6   :  { %1190 = vmatmul.mubr.msk.f32.vlgmr.msra.gmra.mxu0 %vm14_vm0, %v203_v35 }
 0x1a7   :  { %288 = vmatprep.mubr.f32.mxu0 %v1279_v2 }
 0x1a8   :  { %v1516_v8 = vpop.permute.xlu0 %316 }
 0x1a9   :  { %2303 = vst [vmem:[#allocation2_spill] sm:$0xff] %v1516_v8 }
 0x1aa   :  { %1191 = vmatmul.mubr.msk.f32.gmra.mxu0 %vm14_vm0, %v205_v38 }
 0x1ab   :  { %294 = vmatprep.mubr.f32.mxu0 %v1279_v2 }
 0x1ac   :  { %v1526_v12 = vpop.permute.xlu0 %340 }
 0x1ad   :  { %2304 = vst [vmem:[#allocation3_spill] sm:$0xff] %v1526_v12 }
 0x1ae   :  { %1192 = vmatmul.mubr.msk.f32.gmra.mxu0 %vm14_vm0, %v207_v39 }
 0x1af   :  { %300 = vmatprep.mubr.f32.mxu0 %v1279_v2  ;;  %v1502_v2 = vpop.permute.xlu1 %797 }
 0x1b0   :  { %v1536_v13 = vpop.permute.xlu0 %407 }
 0x1b2   :  { %1193 = vmatmul.mubr.msk.f32.gmra.mxu0 %vm14_vm0, %v209_v40 }
 0x1b3   :  { %v1514_v5 = vpop.permute.xlu1 %875 }
 0x1b4   :  { %v1547_v17 = vpop.permute.xlu0 %411 }
 0x1b5   :  { %2306 = vst [vmem:[#allocation5_spill] sm:$0xff] %v1547_v17  ;;  %v1197_v17 = vld [vmem:[%s2271_s1 + $0x5] ss:$8 sm:$0x3] }
 0x1b7   :  { %v1524_v11 = vpop.permute.xlu1 %871 }
 0x1b8   :  { %v1563_v22 = vpop.permute.xlu0 %559 }
 0x1bb   :  { %v1541_v16 = vpop.permute.xlu1 %320 }
 0x1bc   :  { %2305 = vst [vmem:[#allocation4_spill] sm:$0xff] %v1541_v16  ;;  %v1571_v24 = vpop.permute.xlu0 %571 }
 0x1bd   :  { %2311 = vst [vmem:[#allocation10_spill] sm:$0xff] %v1571_v24 }
 0x1bf   :  { %v1549_v18 = vpop.permute.xlu1 %344 }
 0x1c0   :  { %2307 = vst [vmem:[#allocation6_spill] sm:$0xff] %v1549_v18  ;;  %v1583_v26 = vpop.permute.xlu0 %567 }
 0x1c1   :  { %2313 = vst [vmem:[#allocation12_spill] sm:$0xff] %v1583_v26 }
 0x1c3   :  { %v1561_v21 = vpop.permute.xlu1 %415 }
 0x1c4   :  { %2309 = vst [vmem:[#allocation8_spill] sm:$0xff] %v1561_v21  ;;  %v1594_v29 = vpop.permute.xlu0 %645 }
 0x1c5   :  { %2315 = vst [vmem:[#allocation14_spill] sm:$0xff] %v1594_v29 }
 0x1c7   :  { %v1569_v23 = vpop.permute.xlu1 %493 }
 0x1c8   :  { %2310 = vst [vmem:[#allocation9_spill] sm:$0xff] %v1569_v23  ;;  %v1606_v31 = vpop.permute.xlu0 %793 }
 0x1cb   :  { %v1581_v25 = vpop.permute.xlu1 %489 }
 0x1cc   :  { %2312 = vst [vmem:[#allocation11_spill] sm:$0xff] %v1581_v25  ;;  %v1614_v33 = vpop.permute.xlu0 %805 }
 0x1cd   :  { %2318 = vst [vmem:[#allocation17_spill] sm:$0xff] %v1614_v33 }
 0x1cf   :  { %v1592_v28 = vpop.permute.xlu1 %649 }
 0x1d0   :  { %2314 = vst [vmem:[#allocation13_spill] sm:$0xff] %v1592_v28  ;;  %v1624_v35 = vpop.permute.xlu0 %801  ;;  %v1194_v28 = vld [vmem:[%s2271_s1 + $0x1] ss:$8 sm:$0x3] }
 0x1d1   :  { %2320 = vst [vmem:[#allocation19_spill] sm:$0xff] %v1624_v35 }
 0x1d3   :  { %v1604_v30 = vpop.permute.xlu1 %727 }
 0x1d4   :  { %2316 = vst [vmem:[#allocation15_spill] sm:$0xff] %v1604_v30  ;;  %v1200_v30 = vld [vmem:[%s2271_s1 + $0x18] ss:$8 sm:$0x3] }
 0x1d7   :  { %v1612_v32 = vpop.permute.xlu1 %723 }
 0x1d8   :  { %2317 = vst [vmem:[#allocation16_spill] sm:$0xff] %v1612_v32 }
 0x1db   :  { %v1622_v34 = vpop.permute.xlu1 %883 }
 0x1dc   :  { %2319 = vst [vmem:[#allocation18_spill] sm:$0xff] %v1622_v34 }
 0x266   :  { %v284_v45 = vpop.f32.mrf.mxu0 }
 0x267   :  { %v1424_v46 = vadd.f32 %v284_v45, %v185_v44 }
 0x268   :  { %v286_v48 = vpop.f32.mrf.mxu0 }
 0x269   :  { %434 = vrot.lane.b32.xlu0 %v1424_v46, %s1294_s23  ;;  %355 = vrot.lane.b32.xlu1 %v1424_v46, %s1295_s24  ;;  %v1436_v49 = vadd.f32 %v286_v48, %v185_v44 }
 0x26a   :  { %v290_v54 = vpop.f32.mrf.mxu0 }
 0x26b   :  { %v1454_v55 = vadd.f32 %v290_v54, %v190_v41  ;;  %v324_v34 = vmul.f32 %v1430_v47, %v1436_v49 }
 0x26c   :  { %v292_v62 = vpop.f32.mrf.mxu0 }
 0x26d   :  { %668 = vrot.lane.b32.xlu0 %v1424_v46, %s1296_s25  ;;  %512 = vrot.lane.b32.xlu1 %v1424_v46, %s1297_s26  ;;  %v1496_v1 = vadd.f32 %v292_v62, %v190_v41  ;;  %v371_v41 = vlaneseq  ;;  %v348_v24 = vadd.f32 %v1450_v52, %v324_v34  ;;  %v1196_v34 = vld [vmem:[%s2271_s1 + $0x3] ss:$8 sm:$0x3] }
 0x26e   :  { %v296_v9 = vpop.f32.mrf.mxu0 }
 0x26f   :  { %v1522_v10 = vadd.f32 %v296_v9, %v1422_v43  ;;  %v385_v44 = vshrl.u32 %v371_v41, 7  ;;  %v1649_v54 = vand.u32 127, %v371_v41 }
 0x270   :  { %v298_v14 = vpop.f32.mrf.mxu0 }
 0x271   :  { %520 = vrot.lane.b32.xlu0 %v1436_v49, %s1297_s26  ;;  %590 = vrot.lane.b32.xlu1 %v1424_v46, %s1298_s27  ;;  %v1539_v15 = vadd.f32 %v298_v14, %v1422_v43  ;;  %v1653_v62 = vsub.s32 0, %v385_v44  ;;  %v1655_v9 = vsub.s32 1, %v385_v44  ;;  %v382_v14 = vld [vmem:[%s2271_s1] ss:$8 sm:$0x3]  ;;  %v323_v44 = vmul.f32 %v1430_v47, %v1424_v46 }
 0x272   :  { %v302_v19 = vpop.f32.mrf.mxu0  ;;  %vm528_vm1 = vcmp.lt.s32.totalorder %v1649_v54, 15  ;;  %vm373_vm2 = vcmp.lt.s32.totalorder %v1649_v54, 17  ;;  %vm762_vm3 = vcmp.lt.s32.totalorder %v1649_v54, 113  ;;  %vm450_vm4 = vcmp.lt.s32.totalorder %v1649_v54, 16 }
 0x273   :  { %v1556_v20 = vadd.f32 %v302_v19, %v1420_v42  ;;  %v1195_v19 = vld [vmem:[%s2271_s1 + $0x2] ss:$8 sm:$0x3]  ;;  %v1676_v33 = vrot.slane %v382_v14, %v1653_v62  ;;  %v1679_v35 = vrot.slane %v382_v14, %v1655_v9  ;;  %v1713_v29 = vrot.slane %v1194_v28, %v1655_v9 }
 0x274   :  { %vm918_vm5 = vcmp.lt.s32.totalorder %v1649_v54, 111  ;;  %vm606_vm6 = vcmp.lt.s32.totalorder %v1649_v54, 1  ;;  %vm684_vm7 = vcmp.lt.s32.totalorder %v1649_v54, 127  ;;  %vm840_vm8 = vcmp.lt.s32.totalorder %v1649_v54, 112 }
 0x275   :  { %754 = vrot.lane.b32.xlu0 %v1436_v49, %s1299_s28  ;;  %746 = vrot.lane.b32.xlu1 %v1424_v46, %s1299_s28  ;;  %2308 = vst [vmem:[#allocation7_spill] sm:$0xff] %v1556_v20 }
 0x279   :  { %910 = vrot.lane.b32.xlu0 %v1436_v49, %s1300_s29  ;;  %824 = vrot.lane.b32.xlu1 %v1424_v46, %s1282_s16 }
 0x27d   :  { %436 = vrot.lane.b32.xlu0 %v1454_v55, %s1294_s23  ;;  %902 = vrot.lane.b32.xlu1 %v1424_v46, %s1300_s29  ;;  %v1688_v46 = vrot.slane %v1195_v19, %v1655_v9 }
 0x281   :  { %514 = vrot.lane.b32.xlu0 %v1454_v55, %s1297_s26  ;;  %363 = vrot.lane.b32.xlu1 %v1436_v49, %s1295_s24 }
 0x285   :  { %670 = vrot.lane.b32.xlu0 %v1454_v55, %s1296_s25  ;;  %442 = vrot.lane.b32.xlu1 %v1436_v49, %s1294_s23 }
 0x289   :  { %748 = vrot.lane.b32.xlu0 %v1454_v55, %s1299_s28  ;;  %598 = vrot.lane.b32.xlu1 %v1436_v49, %s1298_s27 }
 0x28d   :  { %904 = vrot.lane.b32.xlu0 %v1454_v55, %s1300_s29  ;;  %676 = vrot.lane.b32.xlu1 %v1436_v49, %s1296_s25 }
 0x291   :  { %365 = vrot.lane.b32.xlu0 %v1496_v1, %s1295_s24  ;;  %832 = vrot.lane.b32.xlu1 %v1436_v49, %s1282_s16  ;;  %v1685_v49 = vrot.slane %v1195_v19, %v1653_v62  ;;  %v347_v19 = vadd.f32 %v1450_v52, %v323_v44 }
 0x295   :  { %600 = vrot.lane.b32.xlu0 %v1496_v1, %s1298_s27  ;;  %357 = vrot.lane.b32.xlu1 %v1454_v55, %s1295_s24 }
 0x299   :  { %834 = vrot.lane.b32.xlu0 %v1496_v1, %s1282_s16  ;;  %592 = vrot.lane.b32.xlu1 %v1454_v55, %s1298_s27 }
 0x29d   :  { %879 = vperm.xlu0 %1253, %v1360_v7   ;;  %826 = vrot.lane.b32.xlu1 %v1454_v55, %s1282_s16 }
 0x2a1   :  { %516 = vrot.lane.b32.xlu0 %v1522_v10, %s1297_s26  ;;  %444 = vrot.lane.b32.xlu1 %v1496_v1, %s1294_s23 }
 0x2a5   :  { %750 = vrot.lane.b32.xlu0 %v1522_v10, %s1299_s28  ;;  %522 = vrot.lane.b32.xlu1 %v1496_v1, %s1297_s26 }
 0x2a9   :  { %367 = vrot.lane.b32.xlu0 %v1539_v15, %s1295_s24  ;;  %678 = vrot.lane.b32.xlu1 %v1496_v1, %s1296_s25 }
 0x2ad   :  { %602 = vrot.lane.b32.xlu0 %v1539_v15, %s1298_s27  ;;  %756 = vrot.lane.b32.xlu1 %v1496_v1, %s1299_s28 }
 0x2b1   :  { %518 = vrot.lane.b32.xlu0 %v1556_v20, %s1297_s26  ;;  %961 = vperm.xlu1 %1254, %v1353_v6   ;;  %v304_v6 = vpop.f32.mrf.mxu0 }
 0x2b2   :  { %v1586_v27 = vadd.f32 %v304_v6, %v1420_v42  ;;  %v1198_v6 = vld [vmem:[%s2271_s1 + $0x6] ss:$8 sm:$0x3] }
 0x2b3   :  { %v1697_v14 = vrot.slane %v1198_v6, %v1655_v9 }
 0x2b5   :  { %596 = vrot.lane.b32.xlu0 %v1556_v20, %s1298_s27  ;;  %912 = vrot.lane.b32.xlu1 %v1496_v1, %s1300_s29  ;;  %2322 = vst [vmem:[#allocation21_spill] sm:$0xff] %v1697_v14 }
 0x2b9   :  { %752 = vrot.lane.b32.xlu0 %v1556_v20, %s1299_s28  ;;  %359 = vrot.lane.b32.xlu1 %v1522_v10, %s1295_s24 }
 0x2bd   :  { %830 = vrot.lane.b32.xlu0 %v1556_v20, %s1282_s16  ;;  %438 = vrot.lane.b32.xlu1 %v1522_v10, %s1294_s23 }
 0x2c1   :  { %448 = vrot.lane.b32.xlu0 %v1586_v27, %s1294_s23  ;;  %594 = vrot.lane.b32.xlu1 %v1522_v10, %s1298_s27 }
 0x2c5   :  { %836 = vrot.lane.b32.xlu0 %v1539_v15, %s1282_s16  ;;  %672 = vrot.lane.b32.xlu1 %v1522_v10, %s1296_s25 }
 0x2c9   :  { %682 = vrot.lane.b32.xlu0 %v1586_v27, %s1296_s25  ;;  %828 = vrot.lane.b32.xlu1 %v1522_v10, %s1282_s16 }
 0x2cd   :  { %916 = vrot.lane.b32.xlu0 %v1586_v27, %s1300_s29  ;;  %446 = vrot.lane.b32.xlu1 %v1539_v15, %s1294_s23 }
 0x2d1   :  { %906 = vrot.lane.b32.xlu0 %v1522_v10, %s1300_s29  ;;  %524 = vrot.lane.b32.xlu1 %v1539_v15, %s1297_s26 }
 0x2d5   :  { %680 = vrot.lane.b32.xlu1 %v1539_v15, %s1296_s25  ;;  %1096 = vrot.lane.b32.xlu0 %v1333_v3, %s1301_s30 }
 0x2d9   :  { %758 = vrot.lane.b32.xlu1 %v1539_v15, %s1299_s28 }
 0x2db   :  { %v1629_v36 = vpop.permute.xlu0 %434  ;;  %v356_v37 = vpop.permute.xlu1 %355 }
 0x2dd   :  { %361 = vrot.lane.b32.xlu1 %v1556_v20, %s1295_s24 }
 0x2df   :  { %v513_v38 = vpop.permute.xlu1 %512  ;;  %v1633_v39 = vpop.permute.xlu0 %668 }
 0x2e1   :  { %440 = vrot.lane.b32.xlu1 %v1556_v20, %s1294_s23 }
 0x2e3   :  { %v1637_v40 = vpop.permute.xlu1 %590  ;;  %v521_v42 = vpop.permute.xlu0 %520 }
 0x2e4   :  { %v529_v52 = vsel %vm528_vm1, %v513_v38, %v521_v42  ;;  %v533_v44 = vsel %vm528_vm1, %v521_v42, %v513_v38  ;;  %v1740_v42 = vrot.slane %v1196_v34, %v1655_v9 }
 0x2e5   :  { %674 = vrot.lane.b32.xlu1 %v1556_v20, %s1296_s25  ;;  %v551_v18 = vmul.f32 %v1688_v46, %v529_v52  ;;  %v1761_v52 = vrot.slane %v1197_v17, %v1653_v62 }
 0x2e7   :  { %v1641_v43 = vpop.permute.xlu1 %746  ;;  %v1647_v48 = vpop.permute.xlu0 %754 }
 0x2e9   :  { %369 = vrot.lane.b32.xlu1 %v1586_v27, %s1295_s24 }
 0x2eb   :  { %v1645_v45 = vpop.permute.xlu1 %824  ;;  %v1694_v47 = vpop.permute.xlu0 %910 }
 0x2ed   :  { %908 = vrot.lane.b32.xlu1 %v1556_v20, %s1300_s29 }
 0x2ef   :  { %v1666_v41 = vpop.permute.xlu1 %902  ;;  %v1747_v12 = vpop.permute.xlu0 %436 }
 0x2f1   :  { %957 = vperm.xlu1 %1254, %v1360_v7   ;;  %v1692_v7 = vrot.slane %v1198_v6, %v1653_v62  ;;  %v1710_v6 = vrot.slane %v1194_v28, %v1653_v62  ;;  %v1728_v28 = vrot.slane %v1200_v30, %v1653_v62 }
 0x2f3   :  { %2321 = vst [vmem:[#allocation20_spill] sm:$0xff] %v1692_v7  ;;  %v364_v23 = vpop.permute.xlu1 %363  ;;  %2323 = vst [vmem:[#allocation22_spill] sm:$0xff] %v1728_v28 }
 0x2f4   :  { %v374_v21 = vsel %vm373_vm2, %v356_v37, %v364_v23  ;;  %v378_v32 = vsel %vm373_vm2, %v364_v23, %v356_v37  ;;  %v1731_v37 = vrot.slane %v1200_v30, %v1655_v9  ;;  %v550_v30 = vmul.f32 %v1685_v49, %v533_v44 }
 0x2f5   :  { %v394_v26 = vmul.f32 %v1676_v33, %v378_v32  ;;  %v395_v23 = vmul.f32 %v1679_v35, %v374_v21  ;;  %526 = vrot.lane.b32.xlu1 %v1586_v27, %s1297_s26  ;;  %v1737_v21 = vrot.slane %v1196_v34, %v1653_v62  ;;  %v1764_v44 = vrot.slane %v1197_v17, %v1655_v9  ;;  %v1199_v17 = vld [vmem:[%s2271_s1 + $0x7] ss:$8 sm:$0x3] }
 0x2f6   :  { %2324 = vst [vmem:[#allocation23_spill] sm:$0xff] %v1731_v37  ;;  %v1797_v8 = vrot.slane %v1199_v17, %v1653_v62  ;;  %v923_v62 = vsel %vm918_vm5, %v1694_v47, %v1666_v41 }
 0x2f7   :  { %v418_v25 = vmul.f32 %v1460_v56, %v394_v26  ;;  %v419_v38 = vmul.f32 %v1460_v56, %v395_v23  ;;  %v443_v32 = vpop.permute.xlu1 %442 }
 0x2f8   :  { %v451_v56 = vsel %vm450_vm4, %v1629_v36, %v443_v32  ;;  %v455_v26 = vsel %vm450_vm4, %v443_v32, %v1629_v36  ;;  %v574_v32 = vmul.f32 %v1563_v22, %v550_v30 }
 0x2f9   :  { %v426_v34 = vadd.f32 %v418_v25, %v347_v19  ;;  %v427_v23 = vadd.f32 %v419_v38, %v348_v24  ;;  %v472_v16 = vmul.f32 %v1710_v6, %v455_v26  ;;  %v473_v20 = vmul.f32 %v1713_v29, %v451_v56  ;;  %604 = vrot.lane.b32.xlu1 %v1586_v27, %s1298_s27 }
 0x2fa   :  { %v763_v24 = vsel %vm762_vm3, %v1641_v43, %v1647_v48  ;;  %v767_v25 = vsel %vm762_vm3, %v1647_v48, %v1641_v43  ;;  %v575_v56 = vmul.f32 %v1563_v22, %v551_v18  ;;  %v1794_v22 = vpop.permute.xlu0 %514 }
 0x2fb   :  { %v496_v36 = vmul.f32 %v1452_v53, %v472_v16  ;;  %v497_v19 = vmul.f32 %v1452_v53, %v473_v20  ;;  %v599_v38 = vpop.permute.xlu1 %598  ;;  %v784_v30 = vmul.f32 %v1692_v7, %v763_v24  ;;  %v785_v18 = vmul.f32 %v1697_v14, %v767_v25 }
 0x2fc   :  { %v607_v26 = vsel %vm606_vm6, %v1637_v40, %v599_v38  ;;  %v611_v43 = vsel %vm606_vm6, %v599_v38, %v1637_v40  ;;  %v1800_v40 = vrot.slane %v1199_v17, %v1655_v9  ;;  %v919_v24 = vsel %vm918_vm5, %v1666_v41, %v1694_v47 }
 0x2fd   :  { %v504_v16 = vadd.f32 %v496_v36, %v426_v34  ;;  %v505_v48 = vadd.f32 %v497_v19, %v427_v23  ;;  %v628_v53 = vmul.f32 %v1737_v21, %v611_v43  ;;  %v629_v20 = vmul.f32 %v1740_v42, %v607_v26  ;;  %760 = vrot.lane.b32.xlu1 %v1586_v27, %s1299_s28 }
 0x2fe   :  { %v808_v26 = vmul.f32 %v1606_v31, %v784_v30  ;;  %v809_v41 = vmul.f32 %v1606_v31, %v785_v18 }
 0x2ff   :  { %v583_v34 = vadd.f32 %v575_v56, %v505_v48  ;;  %v582_v23 = vadd.f32 %v574_v32, %v504_v16  ;;  %v652_v36 = vmul.f32 %v1492_v63, %v628_v53  ;;  %v653_v19 = vmul.f32 %v1492_v63, %v629_v20  ;;  %v677_v38 = vpop.permute.xlu1 %676  ;;  %v1828_v53 = vpop.permute.xlu0 %670 }
 0x300   :  { %v685_v9 = vsel %vm684_vm7, %v1633_v39, %v677_v38  ;;  %v689_v25 = vsel %vm684_vm7, %v677_v38, %v1633_v39  ;;  %v940_v39 = vmul.f32 %v1728_v28, %v919_v24  ;;  %v941_v48 = vmul.f32 %v1731_v37, %v923_v62 }
 0x301   :  { %v660_v63 = vadd.f32 %v652_v36, %v582_v23  ;;  %v661_v17 = vadd.f32 %v653_v19, %v583_v34  ;;  %v706_v32 = vmul.f32 %v1761_v52, %v685_v9  ;;  %v707_v56 = vmul.f32 %v1764_v44, %v689_v25  ;;  %838 = vrot.lane.b32.xlu1 %v1586_v27, %s1282_s16 }
 0x302   :  { %v964_v62 = vmul.f32 %v1494_v0, %v940_v39 }
 0x303   :  { %v730_v47 = vmul.f32 %v1474_v59, %v706_v32  ;;  %v731_v43 = vmul.f32 %v1474_v59, %v707_v56  ;;  %v833_v16 = vpop.permute.xlu1 %832 }
 0x304   :  { %v841_v20 = vsel %vm840_vm8, %v1645_v45, %v833_v16  ;;  %v845_v30 = vsel %vm840_vm8, %v833_v16, %v1645_v45  ;;  %v965_v45 = vmul.f32 %v1494_v0, %v941_v48 }
 0x305   :  { %v738_v31 = vadd.f32 %v730_v47, %v660_v63  ;;  %v739_v18 = vadd.f32 %v731_v43, %v661_v17  ;;  %v862_v34 = vmul.f32 %v1797_v8, %v841_v20  ;;  %v863_v59 = vmul.f32 %v1800_v40, %v845_v30  ;;  %914 = vrot.lane.b32.xlu1 %v1539_v15, %s1300_s29  ;;  %v749_v63 = vpop.permute.xlu0 %748 }
 0x306   :  { %v1303_v43 = vmov 51  }
 0x307   :  { %v817_v23 = vadd.f32 %v809_v41, %v739_v18  ;;  %v816_v36 = vadd.f32 %v808_v26, %v738_v31  ;;  %v886_v19 = vmul.f32 %v1524_v11, %v862_v34  ;;  %v887_v38 = vmul.f32 %v1524_v11, %v863_v59  ;;  %v358_v24 = vpop.permute.xlu1 %357  ;;  %v1172_v26 = vld [vmem:[%s2271_s1 + $0x10] ss:$0 sm:$0xff]  ;;  %1255 = vset.pattern.permute.xlu1 %v1303_v43 }
 0x308   :  { %v1302_v41 = vmov 53  }
 0x309   :  { %v894_v9 = vadd.f32 %v886_v19, %v816_v36  ;;  %v895_v25 = vadd.f32 %v887_v38, %v817_v23  ;;  %1256 = vset.pattern.permute.xlu0 %v1302_v41  ;;  %v1853_v47 = vpop.permute.xlu0 %904  ;;  %1093 = vperm.xlu1 %1255, %v1333_v3   ;;  %v325_v23 = vmul.f32 %v1504_v4, %v1454_v55 }
 0x30a   :  { %1175 = vperm.xlu0 %1256, %v1172_v26   ;;  %v326_v36 = vmul.f32 %v1504_v4, %v1496_v1 }
 0x30b   :  { %v1844_v17 = vadd.f32 %v964_v62, %v894_v9  ;;  %v1846_v32 = vadd.f32 %v965_v45, %v895_v25  ;;  %v593_v56 = vpop.permute.xlu1 %592 }
 0x30c   :  { %v350_v26 = vadd.f32 %v1438_v50, %v326_v36 }
 0x30d   :  { %v366_v16 = vpop.permute.xlu0 %365  ;;  %v1861_v30 = vmul.f32 0.70710677, %v1844_v17  ;;  %v1864_v31 = vmul.f32 0.70710677, %v1846_v32 }
 0x30e   :  { %v375_v39 = vsel %vm373_vm2, %v358_v24, %v366_v16  ;;  %v379_v48 = vsel %vm373_vm2, %v366_v16, %v358_v24 }
 0x30f   :  { %v1851_v11 = vpop.permute.xlu1 %826  ;;  %v396_v34 = vmul.f32 %v1676_v33, %v379_v48  ;;  %v397_v59 = vmul.f32 %v1679_v35, %v375_v39  ;;  %v1890_v55 = vand.u32 2147483647, %v1864_v31  ;;  %vm1068_vm9 = vcmp.ge.f32.partialorder %v1861_v30, 0.0 }
 0x310   :  { %vm1069_vm10 = vcmp.ge.f32.partialorder %v1864_v31, 0.0 }
 0x311   :  { %v420_v1 = vmul.f32 %v1536_v13, %v396_v34  ;;  %v421_v4 = vmul.f32 %v1536_v13, %v397_v59  ;;  %v601_v41 = vpop.permute.xlu0 %600  ;;  %v993_v13 = vmul.f32 0.3275911, %v1890_v55 }
 0x312   :  { %v612_v43 = vsel %vm606_vm6, %v601_v41, %v593_v56  ;;  %v608_v48 = vsel %vm606_vm6, %v593_v56, %v601_v41 }
 0x313   :  { %v445_v0 = vpop.permute.xlu1 %444  ;;  %v630_v59 = vmul.f32 %v1737_v21, %v612_v43  ;;  %v631_v56 = vmul.f32 %v1740_v42, %v608_v48 }
 0x314   :  { %v452_v18 = vsel %vm450_vm4, %v1747_v12, %v445_v0  ;;  %v456_v3 = vsel %vm450_vm4, %v445_v0, %v1747_v12  ;;  %v1885_v12 = vand.u32 2147483647, %v1861_v30 }
 0x315   :  { %v474_v24 = vmul.f32 %v1710_v6, %v456_v3  ;;  %v475_v62 = vmul.f32 %v1713_v29, %v452_v18  ;;  %v429_v18 = vadd.f32 %v421_v4, %v350_v26  ;;  %v835_v41 = vpop.permute.xlu0 %834 }
 0x316   :  { %v992_v0 = vmul.f32 0.3275911, %v1885_v12 }
 0x317   :  { %v523_v20 = vpop.permute.xlu1 %522  ;;  %v498_v16 = vmul.f32 %v1440_v51, %v474_v24  ;;  %v499_v39 = vmul.f32 %v1440_v51, %v475_v62  ;;  %v997_v24 = vadd.f32 1.0, %v993_v13 }
 0x318   :  { %v530_v19 = vsel %vm528_vm1, %v1794_v22, %v523_v20  ;;  %v534_v38 = vsel %vm528_vm1, %v523_v20, %v1794_v22  ;;  %v349_v22 = vadd.f32 %v1438_v50, %v325_v23  ;;  %v996_v36 = vadd.f32 1.0, %v992_v0 }
 0x319   :  { %v552_v9 = vmul.f32 %v1685_v49, %v534_v38  ;;  %v553_v25 = vmul.f32 %v1688_v46, %v530_v19  ;;  %v507_v38 = vadd.f32 %v499_v39, %v429_v18  ;;  %v842_v39 = vsel %vm840_vm8, %v1851_v11, %v835_v41  ;;  %v1938_v18 = vpop.permute.xlu0 %879 }
 0x31a   :  { %v428_v20 = vadd.f32 %v420_v1, %v349_v22  ;;  %1261 = vrcp.f32 %v996_v36  ;;  %2326 = vst [vmem:[#allocation25_spill] sm:$0xff] %v1938_v18  ;;  %v2328_v18 = vld [vmem:[#allocation2_spill] sm:$0xff] }
 0x31b   :  { %v679_v45 = vpop.permute.xlu1 %678  ;;  %v576_v3 = vmul.f32 %v1472_v58, %v552_v9  ;;  %v577_v50 = vmul.f32 %v1472_v58, %v553_v25  ;;  %1263 = vrcp.f32 %v997_v24 }
 0x31c   :  { %v686_v23 = vsel %vm684_vm7, %v1828_v53, %v679_v45  ;;  %v690_v51 = vsel %vm684_vm7, %v679_v45, %v1828_v53  ;;  %v506_v19 = vadd.f32 %v498_v16, %v428_v20  ;;  %v654_v53 = vmul.f32 %v1480_v60, %v630_v59 }
 0x31d   :  { %v585_v4 = vadd.f32 %v577_v50, %v507_v38  ;;  %v708_v9 = vmul.f32 %v1761_v52, %v686_v23  ;;  %v709_v25 = vmul.f32 %v1764_v44, %v690_v51  ;;  %v655_v45 = vmul.f32 %v1480_v60, %v631_v56  ;;  %v1952_v24 = vpop.permute.xlu0 %516 }
 0x31e   :  { %v584_v1 = vadd.f32 %v576_v3, %v506_v19  ;;  %v846_v60 = vsel %vm840_vm8, %v835_v41, %v1851_v11  ;;  %v864_v3 = vmul.f32 %v1797_v8, %v842_v39 }
 0x31f   :  { %v757_v34 = vpop.permute.xlu1 %756  ;;  %v663_v43 = vadd.f32 %v655_v45, %v585_v4  ;;  %v733_v16 = vmul.f32 %v1462_v57, %v709_v25 }
 0x320   :  { %v764_v58 = vsel %vm762_vm3, %v749_v63, %v757_v34  ;;  %v768_v62 = vsel %vm762_vm3, %v757_v34, %v749_v63  ;;  %v662_v0 = vadd.f32 %v654_v53, %v584_v1  ;;  %v732_v63 = vmul.f32 %v1462_v57, %v708_v9 }
 0x321   :  { %v786_v22 = vmul.f32 %v1692_v7, %v764_v58  ;;  %v787_v26 = vmul.f32 %v1697_v14, %v768_v62  ;;  %v865_v57 = vmul.f32 %v1800_v40, %v846_v60  ;;  %v741_v34 = vadd.f32 %v733_v16, %v663_v43  ;;  %v1975_v41 = vpop.permute.xlu0 %750  ;;  %v2331_v14 = vld [vmem:[#allocation4_spill] sm:$0xff] }
 0x322   :  { %v740_v50 = vadd.f32 %v732_v63, %v662_v0  ;;  %v888_v36 = vmul.f32 %v1514_v5, %v864_v3 }
 0x323   :  { %v810_v13 = vmul.f32 %v1502_v2, %v786_v22  ;;  %v811_v48 = vmul.f32 %v1502_v2, %v787_v26  ;;  %v889_v56 = vmul.f32 %v1514_v5, %v865_v57 }
 0x325   :  { %v818_v59 = vadd.f32 %v810_v13, %v740_v50  ;;  %v819_v23 = vadd.f32 %v811_v48, %v741_v34  ;;  %v368_v50 = vpop.permute.xlu0 %367 }
 0x327   :  { %v896_v58 = vadd.f32 %v888_v36, %v818_v59  ;;  %v897_v62 = vadd.f32 %v889_v56, %v819_v23  ;;  %v1958_v25 = vpop.eup %1261 }
 0x329   :  { %v1990_v56 = vpop.permute.xlu0 %602 }
 0x32c   :  { %v1936_v20 = vpop.permute.xlu1 %961 }
 0x32d   :  { %2325 = vst [vmem:[#allocation24_spill] sm:$0xff] %v1936_v20 }
 0x330   :  { %v913_v51 = vpop.permute.xlu1 %912 }
 0x331   :  { %v920_v11 = vsel %vm918_vm5, %v1853_v47, %v913_v51  ;;  %v924_v2 = vsel %vm918_vm5, %v913_v51, %v1853_v47  ;;  %v1960_v47 = vpop.eup %1263  ;;  %v1044_v51 = vsub.f32 0.0, %v1885_v12 }
 0x332   :  { %v942_v19 = vmul.f32 %v1728_v28, %v920_v11  ;;  %v943_v38 = vmul.f32 %v1731_v37, %v924_v2  ;;  %v1009_v0 = vmul.f32 1.0614054, %v1960_v47  ;;  %v1045_v11 = vsub.f32 0.0, %v1890_v55 }
 0x333   :  { %v327_v37 = vmul.f32 %v2328_v18, %v1522_v10 }
 0x334   :  { %v966_v1 = vmul.f32 %v1482_v61, %v942_v19  ;;  %v967_v4 = vmul.f32 %v1482_v61, %v943_v38  ;;  %v1956_v9 = vpop.permute.xlu1 %359  ;;  %v1008_v61 = vmul.f32 1.0614054, %v1958_v25  ;;  %v1013_v48 = vadd.f32 -1.4531521, %v1009_v0 }
 0x335   :  { %v1048_v38 = vmul.f32 %v1044_v51, %v1885_v12  ;;  %v376_v10 = vsel %vm373_vm2, %v1956_v9, %v368_v50 }
 0x336   :  { %v1962_v53 = vadd.f32 %v966_v1, %v896_v58  ;;  %v1964_v5 = vadd.f32 %v967_v4, %v897_v62  ;;  %v1012_v13 = vadd.f32 -1.4531521, %v1008_v61  ;;  %v1017_v23 = vmul.f32 %v1960_v47, %v1013_v48 }
 0x337   :  { %v1049_v58 = vmul.f32 %v1045_v11, %v1890_v55  ;;  %v1052_v61 = vmul.f32 1.442695, %v1048_v38 }
 0x338   :  { %v1967_v45 = vmul.f32 0.70710677, %v1962_v53  ;;  %v1970_v22 = vmul.f32 0.70710677, %v1964_v5  ;;  %v1972_v26 = vpop.permute.xlu1 %438  ;;  %v1016_v59 = vmul.f32 %v1958_v25, %v1012_v13  ;;  %v1021_v19 = vadd.f32 1.4214138, %v1017_v23 }
 0x339   :  { %v1054_v0 = vmul.f32 1.442695, %v1049_v58 }
 0x33a   :  { %v990_v43 = vand.u32 2147483647, %v1967_v45  ;;  %v991_v63 = vand.u32 2147483647, %v1970_v22  ;;  %v1020_v36 = vadd.f32 1.4214138, %v1016_v59  ;;  %v1025_v4 = vmul.f32 %v1960_v47, %v1021_v19 }
 0x33b   :  { %vm1070_vm11 = vcmp.ge.f32.partialorder %v1967_v45, 0.0  ;;  %vm1071_vm12 = vcmp.ge.f32.partialorder %v1970_v22, 0.0  ;;  %v2352_v22 = vld [vmem:[#allocation25_spill] sm:$0xff] }
 0x33c   :  { %v994_v16 = vmul.f32 0.3275911, %v990_v43  ;;  %v995_v39 = vmul.f32 0.3275911, %v991_v63  ;;  %v1980_v60 = vpop.permute.xlu1 %594  ;;  %v1024_v1 = vmul.f32 %v1958_v25, %v1020_v36 }
 0x33e   :  { %v998_v3 = vadd.f32 1.0, %v994_v16  ;;  %v999_v57 = vadd.f32 1.0, %v995_v39  ;;  %v1996_v16 = vpop.permute.xlu0 %518  ;;  %v1028_v13 = vadd.f32 -0.28449672, %v1024_v1  ;;  %v1046_v1 = vsub.f32 0.0, %v990_v43 }
 0x340   :  { %1265 = vrcp.f32 %v998_v3  ;;  %v1982_v34 = vpop.permute.xlu1 %672  ;;  %v1029_v3 = vadd.f32 -0.28449672, %v1025_v4  ;;  %v1032_v23 = vmul.f32 %v1958_v25, %v1028_v13 }
 0x341   :  { %1267 = vrcp.f32 %v999_v57 }
 0x342   :  { %1269 = vpow2.f32 %v1052_v61  ;;  %v2007_v51 = vpop.permute.xlu0 %596  ;;  %v1033_v19 = vmul.f32 %v1960_v47, %v1029_v3  ;;  %v1036_v61 = vadd.f32 0.2548296, %v1032_v23 }
 0x343   :  { %1271 = vpow2.f32 %v1054_v0  ;;  %2327 = vst [vmem:[#allocation26_spill] sm:$0xff] %v2007_v51  ;;  %v1047_v0 = vsub.f32 0.0, %v991_v63  ;;  %v2330_v51 = vld [vmem:[#allocation7_spill] sm:$0xff] }
 0x344   :  { %v1988_v2 = vpop.permute.xlu1 %828  ;;  %v1037_v20 = vadd.f32 0.2548296, %v1033_v19  ;;  %v1040_v23 = vmul.f32 %v1958_v25, %v1036_v61  ;;  %v329_v7 = vmul.f32 %v2331_v14, %v2330_v51 }
 0x345   :  { %v1051_v19 = vmul.f32 %v1047_v0, %v991_v63 }
 0x346   :  { %v2016_v13 = vpop.permute.xlu0 %752 }
 0x347   :  { %2329 = vst [vmem:[#allocation2_spill] sm:$0xff] %v2016_v13  ;;  %v1041_v13 = vmul.f32 %v1960_v47, %v1037_v20 }
 0x348   :  { %v447_v62 = vpop.permute.xlu1 %446 }
 0x349   :  { %v453_v25 = vsel %vm450_vm4, %v1972_v26, %v447_v62 }
 0x34a   :  { %v2048_v61 = vpop.permute.xlu0 %830 }
 0x34c   :  { %v525_v39 = vpop.permute.xlu1 %524 }
 0x34d   :  { %v1998_v48 = vpop.eup %1265 }
 0x34e   :  { %v2000_v57 = vpop.eup %1267  ;;  %v1010_v55 = vmul.f32 1.0614054, %v1998_v48 }
 0x34f   :  { %v1011_v12 = vmul.f32 1.0614054, %v2000_v57 }
 0x350   :  { %v2004_v59 = vpop.permute.xlu1 %680  ;;  %v1014_v36 = vadd.f32 -1.4531521, %v1010_v55 }
 0x351   :  { %v1015_v11 = vadd.f32 -1.4531521, %v1011_v12  ;;  %v380_v12 = vsel %vm373_vm2, %v368_v50, %v1956_v9  ;;  %v457_v9 = vsel %vm450_vm4, %v447_v62, %v1972_v26  ;;  %v531_v26 = vsel %vm528_vm1, %v1952_v24, %v525_v39 }
 0x352   :  { %v1018_v58 = vmul.f32 %v1998_v48, %v1014_v36  ;;  %v1050_v36 = vmul.f32 %v1046_v1, %v990_v43  ;;  %v1270_v43 = vpop.eup %1269  ;;  %v1058_v1 = vmul.f32 1.442695, %v1051_v19  ;;  %v535_v62 = vsel %vm528_vm1, %v525_v39, %v1952_v24  ;;  %v2334_v19 = vld [vmem:[#allocation5_spill] sm:$0xff] }
 0x353   :  { %v1019_v38 = vmul.f32 %v2000_v57, %v1015_v11  ;;  %v328_v11 = vmul.f32 %v2328_v18, %v1539_v15  ;;  %v398_v18 = vmul.f32 %v1676_v33, %v380_v12  ;;  %v1272_v63 = vpop.eup %1271  ;;  %v1060_v51 = vmul.f32 %v1270_v43, %v1040_v23  ;;  %v2333_v12 = vld [vmem:[#allocation6_spill] sm:$0xff] }
 0x354   :  { %v2012_v4 = vpop.permute.xlu1 %758  ;;  %v1022_v55 = vadd.f32 1.4214138, %v1018_v58  ;;  %v2332_v58 = vld [vmem:[#allocation3_spill] sm:$0xff]  ;;  %v1061_v0 = vmul.f32 %v1272_v63, %v1041_v13  ;;  %v2065_v23 = vmul.f32 0.5, %v1844_v17  ;;  %v555_v39 = vmul.f32 %v1688_v46, %v531_v26  ;;  %v2336_v26 = vld [vmem:[#allocation12_spill] sm:$0xff] }
 0x355   :  { %v1023_v3 = vadd.f32 1.4214138, %v1019_v38  ;;  %v330_v38 = vmul.f32 %v2331_v14, %v1586_v27  ;;  %v351_v15 = vadd.f32 %v2332_v58, %v327_v37  ;;  %v352_v27 = vadd.f32 %v2332_v58, %v328_v11 }
 0x356   :  { %v1026_v47 = vmul.f32 %v1998_v48, %v1022_v55  ;;  %v1056_v14 = vmul.f32 1.442695, %v1050_v36  ;;  %v399_v37 = vmul.f32 %v1679_v35, %v376_v10  ;;  %v476_v11 = vmul.f32 %v1710_v6, %v457_v9 }
 0x357   :  { %v1027_v20 = vmul.f32 %v2000_v57, %v1023_v3  ;;  %v2057_v3 = vadd.f32 %v2333_v12, %v329_v7  ;;  %v2060_v55 = vadd.f32 %v2333_v12, %v330_v38  ;;  %v477_v36 = vmul.f32 %v1713_v29, %v453_v25 }
 0x358   :  { %v2023_v28 = vpop.permute.xlu1 %361  ;;  %v422_v10 = vmul.f32 %v2334_v19, %v398_v18  ;;  %v1030_v43 = vadd.f32 -0.28449672, %v1026_v47  ;;  %1273 = vpow2.f32 %v1056_v14  ;;  %v423_v24 = vmul.f32 %v2334_v19, %v399_v37 }
 0x359   :  { %v1031_v58 = vadd.f32 -0.28449672, %v1027_v20  ;;  %v554_v7 = vmul.f32 %v1685_v49, %v535_v62  ;;  %1275 = vpow2.f32 %v1058_v1  ;;  %v2074_v38 = vmul.f32 0.5, %v1846_v32  ;;  %v2335_v20 = vld [vmem:[#allocation11_spill] sm:$0xff]  ;;  %v449_v32 = vpop.permute.xlu0 %448 }
 0x35a   :  { %v1065_v25 = vsub.f32 1.0, %v1061_v0  ;;  %v1064_v17 = vsub.f32 1.0, %v1060_v51  ;;  %v609_v18 = vsel %vm606_vm6, %v1980_v60, %v1990_v56  ;;  %v613_v9 = vsel %vm606_vm6, %v1990_v56, %v1980_v60 }
 0x35b   :  { %v500_v47 = vmul.f32 %v2335_v20, %v476_v11  ;;  %v501_v63 = vmul.f32 %v2335_v20, %v477_v36  ;;  %v1035_v14 = vmul.f32 %v2000_v57, %v1031_v58  ;;  %v1034_v37 = vmul.f32 %v1998_v48, %v1030_v43 }
 0x35c   :  { %v2046_v50 = vpop.permute.xlu1 %440  ;;  %v430_v51 = vadd.f32 %v422_v10, %v351_v15  ;;  %v431_v1 = vadd.f32 %v423_v24, %v352_v27  ;;  %v578_v62 = vmul.f32 %v2336_v26, %v554_v7  ;;  %v579_v0 = vmul.f32 %v2336_v26, %v555_v39 }
 0x35d   :  { %v632_v56 = vmul.f32 %v1737_v21, %v613_v9  ;;  %v633_v12 = vmul.f32 %v1740_v42, %v609_v18  ;;  %v1073_v11 = vsub.f32 0.0, %v1065_v25  ;;  %v1072_v36 = vsub.f32 0.0, %v1064_v17 }
 0x35e   :  { %v508_v19 = vadd.f32 %v500_v47, %v430_v51  ;;  %v509_v20 = vadd.f32 %v501_v63, %v431_v1  ;;  %v687_v58 = vsel %vm684_vm7, %v1982_v34, %v2004_v59  ;;  %v691_v15 = vsel %vm684_vm7, %v2004_v59, %v1982_v34  ;;  %v837_v34 = vpop.permute.xlu0 %836 }
 0x35f   :  { %v1039_v43 = vadd.f32 0.2548296, %v1035_v14  ;;  %v1038_v24 = vadd.f32 0.2548296, %v1034_v37  ;;  %v2109_v7 = vmul.f32 0.5, %v1962_v53  ;;  %v2114_v47 = vmul.f32 0.5, %v1964_v5 }
 0x360   :  { %v2071_v13 = vpop.permute.xlu1 %674  ;;  %v586_v39 = vadd.f32 %v578_v62, %v508_v19  ;;  %v587_v18 = vadd.f32 %v579_v0, %v509_v20  ;;  %v710_v59 = vmul.f32 %v1761_v52, %v687_v58  ;;  %v711_v63 = vmul.f32 %v1764_v44, %v691_v15  ;;  %v2337_v53 = vld [vmem:[#allocation14_spill] sm:$0xff]  ;;  %v2339_v20 = vld [vmem:[#allocation8_spill] sm:$0xff] }
 0x361   :  { %v1076_v14 = vsel %vm1068_vm9, %v1064_v17, %v1072_v36  ;;  %v656_v37 = vmul.f32 %v2337_v53, %v632_v56  ;;  %v657_v51 = vmul.f32 %v2337_v53, %v633_v12  ;;  %v843_v26 = vsel %vm840_vm8, %v1988_v2, %v837_v34  ;;  %v2338_v56 = vld [vmem:[#allocation16_spill] sm:$0xff] }
 0x362   :  { %v847_v31 = vsel %vm840_vm8, %v837_v34, %v1988_v2  ;;  %v1042_v30 = vmul.f32 %v1998_v48, %v1038_v24  ;;  %v734_v12 = vmul.f32 %v2338_v56, %v710_v59  ;;  %v454_v2 = vsel %vm450_vm4, %v2046_v50, %v449_v32 }
 0x363   :  { %v664_v17 = vadd.f32 %v656_v37, %v586_v39  ;;  %v665_v62 = vadd.f32 %v657_v51, %v587_v18  ;;  %v458_v48 = vsel %vm450_vm4, %v449_v32, %v2046_v50  ;;  %v2149_v36 = vmul.f32 %v1797_v8, %v843_v26 }
 0x364   :  { %v370_v60 = vpop.permute.xlu1 %369  ;;  %v2152_v19 = vmul.f32 %v1800_v40, %v847_v31  ;;  %v769_v50 = vsel %vm762_vm3, %v2012_v4, %v1975_v41  ;;  %v478_v24 = vmul.f32 %v1710_v6, %v458_v48  ;;  %v479_v39 = vmul.f32 %v1713_v29, %v454_v2  ;;  %v2341_v31 = vld [vmem:[#allocation10_spill] sm:$0xff]  ;;  %v2345_v2 = vld [vmem:[#allocation15_spill] sm:$0xff] }
 0x365   :  { %v377_v27 = vsel %vm373_vm2, %v2023_v28, %v370_v60  ;;  %v381_v10 = vsel %vm373_vm2, %v370_v60, %v2023_v28  ;;  %v1077_v28 = vsel %vm1069_vm10, %v1065_v25, %v1073_v11  ;;  %v1043_v25 = vmul.f32 %v2000_v57, %v1039_v43 }
 0x366   :  { %v400_v1 = vmul.f32 %v1676_v33, %v381_v10  ;;  %v401_v5 = vmul.f32 %v1679_v35, %v377_v27  ;;  %v2136_v60 = vadd.f32 1.0, %v1077_v28  ;;  %v2138_v33 = vadd.f32 1.0, %v1076_v14  ;;  %v1274_v35 = vpop.eup %1273  ;;  %v683_v27 = vpop.permute.xlu0 %682 }
 0x367   :  { %v735_v11 = vmul.f32 %v2338_v56, %v711_v63  ;;  %v1276_v57 = vpop.eup %1275  ;;  %v765_v10 = vsel %vm762_vm3, %v1975_v41, %v2012_v4  ;;  %v1062_v43 = vmul.f32 %v1274_v35, %v1042_v30  ;;  %v688_v18 = vsel %vm684_vm7, %v2071_v13, %v683_v27 }
 0x368   :  { %v2111_v9 = vpop.permute.xlu1 %908  ;;  %v424_v58 = vmul.f32 %v2339_v20, %v400_v1  ;;  %v425_v15 = vmul.f32 %v2339_v20, %v401_v5  ;;  %v1063_v32 = vmul.f32 %v1276_v57, %v1043_v25  ;;  %v692_v34 = vsel %vm684_vm7, %v683_v27, %v2071_v13  ;;  %v2340_v5 = vld [vmem:[#allocation9_spill] sm:$0xff] }
 0x369   :  { %v742_v63 = vadd.f32 %v734_v12, %v664_v17  ;;  %v743_v28 = vadd.f32 %v735_v11, %v665_v62  ;;  %v712_v53 = vmul.f32 %v1761_v52, %v688_v18  ;;  %v713_v37 = vmul.f32 %v1764_v44, %v692_v34  ;;  %v2344_v62 = vld [vmem:[#allocation26_spill] sm:$0xff] }
 0x36a   :  { %v432_v29 = vadd.f32 %v424_v58, %v2057_v3  ;;  %v433_v4 = vadd.f32 %v425_v15, %v2060_v55  ;;  %v1067_v51 = vsub.f32 1.0, %v1063_v32  ;;  %v1066_v1 = vsub.f32 1.0, %v1062_v43  ;;  %v917_v15 = vpop.permute.xlu0 %916 }
 0x36b   :  { %v503_v26 = vmul.f32 %v2340_v5, %v479_v39  ;;  %v736_v48 = vmul.f32 %v2345_v2, %v712_v53  ;;  %v737_v57 = vmul.f32 %v2345_v2, %v713_v37  ;;  %v2347_v39 = vld [vmem:[#allocation2_spill] sm:$0xff]  ;;  %v1085_v54 = vmul.f32 %v2136_v60, %v2074_v38 }
 0x36c   :  { %v2134_v0 = vpop.permute.xlu1 %957  ;;  %v1075_v20 = vsub.f32 0.0, %v1067_v51  ;;  %v1074_v58 = vsub.f32 0.0, %v1066_v1  ;;  %v1277_v38 = vld [vmem:[%s2270_s0] sm:$0xff] }
 0x36d   :  { %v511_v56 = vadd.f32 %v503_v26, %v433_v4  ;;  %v2348_v4 = vld [vmem:[#allocation19_spill] sm:$0xff] }
 0x36e   :  { %v1078_v53 = vsel %vm1070_vm11, %v1066_v1, %v1074_v58  ;;  %v891_v1 = vmul.f32 %v2352_v22, %v2152_v19 }
 0x370   :  { %v527_v59 = vpop.permute.xlu1 %526 }
 0x371   :  { %v532_v41 = vsel %vm528_vm1, %v1996_v16, %v527_v59  ;;  %v536_v6 = vsel %vm528_vm1, %v527_v59, %v1996_v16  ;;  %v502_v16 = vmul.f32 %v2340_v5, %v478_v24 }
 0x372   :  { %v556_v14 = vmul.f32 %v1685_v49, %v536_v6  ;;  %v557_v13 = vmul.f32 %v1688_v46, %v532_v41  ;;  %v2342_v49 = vld [vmem:[#allocation20_spill] sm:$0xff]  ;;  %v2343_v46 = vld [vmem:[#allocation21_spill] sm:$0xff] }
 0x373   :  { %v788_v30 = vmul.f32 %v2342_v49, %v765_v10  ;;  %v789_v17 = vmul.f32 %v2343_v46, %v769_v50  ;;  %v510_v35 = vadd.f32 %v502_v16, %v432_v29  ;;  %v2346_v50 = vld [vmem:[#allocation13_spill] sm:$0xff] }
 0x374   :  { %v580_v3 = vmul.f32 %v2341_v31, %v556_v14  ;;  %v581_v55 = vmul.f32 %v2341_v31, %v557_v13  ;;  %v605_v25 = vpop.permute.xlu1 %604  ;;  %v2349_v16 = vld [vmem:[#allocation17_spill] sm:$0xff] }
 0x375   :  { %v610_v52 = vsel %vm606_vm6, %v2344_v62, %v605_v25  ;;  %v614_v44 = vsel %vm606_vm6, %v605_v25, %v2344_v62  ;;  %v812_v14 = vmul.f32 %v2348_v4, %v788_v30  ;;  %v813_v13 = vmul.f32 %v2348_v4, %v789_v17 }
 0x376   :  { %v634_v12 = vmul.f32 %v1737_v21, %v614_v44  ;;  %v635_v11 = vmul.f32 %v1740_v42, %v610_v52  ;;  %v588_v27 = vadd.f32 %v580_v3, %v510_v35  ;;  %v589_v10 = vadd.f32 %v581_v55, %v511_v56  ;;  %v2350_v55 = vld [vmem:[#allocation22_spill] sm:$0xff] }
 0x377   :  { %v922_v21 = vsel %vm918_vm5, %v2111_v9, %v917_v15  ;;  %v926_v42 = vsel %vm918_vm5, %v917_v15, %v2111_v9  ;;  %v1079_v9 = vsel %vm1071_vm12, %v1067_v51, %v1075_v20  ;;  %v890_v51 = vmul.f32 %v2352_v22, %v2149_v36  ;;  %v2354_v36 = vld [vmem:[#allocation24_spill] sm:$0xff] }
 0x378   :  { %v658_v32 = vmul.f32 %v2346_v50, %v634_v12  ;;  %v659_v43 = vmul.f32 %v2346_v50, %v635_v11  ;;  %v761_v24 = vpop.permute.xlu1 %760  ;;  %v946_v25 = vmul.f32 %v2350_v55, %v922_v21  ;;  %v820_v52 = vadd.f32 %v812_v14, %v742_v63  ;;  %v907_v12 = vpop.permute.xlu0 %906 }
 0x379   :  { %v766_v18 = vsel %vm762_vm3, %v2347_v39, %v761_v24  ;;  %v770_v34 = vsel %vm762_vm3, %v761_v24, %v2347_v39  ;;  %v821_v44 = vadd.f32 %v813_v13, %v743_v28  ;;  %v1083_v35 = vadd.f32 1.0, %v1079_v9 }
 0x37a   :  { %v666_v59 = vadd.f32 %v658_v32, %v588_v27  ;;  %v667_v41 = vadd.f32 %v659_v43, %v589_v10  ;;  %v790_v6 = vmul.f32 %v2342_v49, %v766_v18  ;;  %v791_v29 = vmul.f32 %v2343_v46, %v770_v34  ;;  %v2351_v49 = vld [vmem:[#allocation23_spill] sm:$0xff] }
 0x37b   :  { %v947_v46 = vmul.f32 %v2351_v49, %v926_v42  ;;  %v1082_v56 = vadd.f32 1.0, %v1078_v53  ;;  %v970_v58 = vmul.f32 %v2354_v36, %v946_v25  ;;  %v898_v10 = vadd.f32 %v890_v51, %v820_v52 }
 0x37c   :  { %v744_v37 = vadd.f32 %v736_v48, %v666_v59  ;;  %v745_v5 = vadd.f32 %v737_v57, %v667_v41  ;;  %v814_v26 = vmul.f32 %v2349_v16, %v790_v6  ;;  %v815_v31 = vmul.f32 %v2349_v16, %v791_v29  ;;  %v839_v3 = vpop.permute.xlu1 %838  ;;  %v2353_v48 = vld [vmem:[#allocation18_spill] sm:$0xff]  ;;  %v1097_v29 = vpop.permute.xlu0 %1096 }
 0x37d   :  { %v844_v30 = vsel %vm840_vm8, %v2048_v61, %v839_v3  ;;  %v848_v45 = vsel %vm840_vm8, %v839_v3, %v2048_v61  ;;  %v971_v19 = vmul.f32 %v2354_v36, %v947_v46  ;;  %v1087_v50 = vmul.f32 %v1083_v35, %v2114_v47 }
 0x37e   :  { %v868_v17 = vmul.f32 %v1797_v8, %v844_v30  ;;  %v869_v62 = vmul.f32 %v1800_v40, %v848_v45  ;;  %v822_v11 = vadd.f32 %v814_v26, %v744_v37  ;;  %v823_v2 = vadd.f32 %v815_v31, %v745_v5 }
 0x37f   :  { %v1086_v32 = vmul.f32 %v1082_v56, %v2109_v7  ;;  %v899_v43 = vadd.f32 %v891_v1, %v821_v44  ;;  %v1084_v18 = vmul.f32 %v2138_v33, %v2065_v23  ;;  %v1278_v33 = vld [vmem:[%s2270_s0 + $0x8] sm:$0xff] }
 0x380   :  { %v892_v57 = vmul.f32 %v2353_v48, %v868_v17  ;;  %v893_v61 = vmul.f32 %v2353_v48, %v869_v62  ;;  %v915_v20 = vpop.permute.xlu1 %914 }
 0x381   :  { %v921_v8 = vsel %vm918_vm5, %v907_v12, %v915_v20  ;;  %v925_v40 = vsel %vm918_vm5, %v915_v20, %v907_v12 }
 0x382   :  { %v900_v63 = vadd.f32 %v892_v57, %v822_v11  ;;  %v901_v28 = vadd.f32 %v893_v61, %v823_v2  ;;  %v944_v15 = vmul.f32 %v2350_v55, %v921_v8  ;;  %v945_v27 = vmul.f32 %v2351_v49, %v925_v40 }
 0x384   :  { %v978_v24 = vadd.f32 %v970_v58, %v900_v63  ;;  %v968_v21 = vmul.f32 %v2134_v0, %v944_v15  ;;  %v969_v42 = vmul.f32 %v2134_v0, %v945_v27  ;;  %v979_v39 = vadd.f32 %v971_v19, %v901_v28  ;;  %v1094_v4 = vpop.permute.xlu1 %1093 }
 0x385   :  { %v1176_v0 = vpop.permute.xlu0 %1175 }
 0x386   :  { %v976_v34 = vadd.f32 %v968_v21, %v898_v10  ;;  %v1091_v59 = vmul.f32 %v1087_v50, %v979_v39  ;;  %v1090_v41 = vmul.f32 %v1086_v32, %v978_v24  ;;  %v977_v6 = vadd.f32 %v969_v42, %v899_v43 }
 0x387   :  { %v1178_v23 = vmul.f32 %v1277_v38, %v1176_v0  ;;  %v1179_v14 = vmul.f32 %v1278_v33, %v1176_v0 }
 0x388   :  { %1129 = vmatprep.subr.mxu1 %v1091_v59  ;;  %v1089_v47 = vmul.f32 %v1085_v54, %v977_v6  ;;  %v1088_v7 = vmul.f32 %v1084_v18, %v976_v34 }
 0x389   :  { %1130 = vmatpush1.msra.mxu1 %v1090_v41 }
 0x38a   :  { %1131 = vmatprep.subr.mxu1 %v1089_v47 }
 0x38b   :  { %1132 = vmatpush1.msra.mxu1 %v1088_v7 }
 0x38c   :  { %1201 = vmatmul.mubr.msk.f32.vlgmr.msra.gmra.mxu1 %vm1098_vm13, %v1097_v29 }
 0x44c   :  { %v1167_v60 = vpop.f32.mrf.mxu1 }
 0x44d   :  { %v1168_v13 = vadd.f32 %v1167_v60, %v1094_v4 }
 0x44e   :  { %v1169_v9 = vpop.f32.mrf.mxu1 }
 0x44f   :  { %v1180_v53 = vadd.f32 %v1178_v23, %v1168_v13  ;;  %v1170_v37 = vadd.f32 %v1169_v9, %v1094_v4 }
 0x451   :  { %1182 = vst [vmem:[%s2272_s2] sm:$0xff] %v1180_v53  ;;  %v1181_v5 = vadd.f32 %v1179_v14, %v1170_v37 }
 0x453   :  { %1183 = vst [vmem:[%s2272_s2 + $0x8] sm:$0xff] %v1181_v5 }

</bundles_post_ra>
